<compile_context>
chip_gen: v7x
topology: tpu7x:2x2x1
jax: 0.10.0
libtpu: 0.0.40
codegen_flags: <defaults>
</compile_context>

<pallas_src>
import jax
import jax.numpy as jnp
from jax.experimental import pallas as pl
from jax.experimental.pallas import tpu as pltpu

EPS = 1e-5


def resnet_block_kernel(x_ref, w1_ref, w2_ref, o_ref):
    x = x_ref[0]                                   # (H, W, C) f32 (kept f32 for the skip)
    H, W, C = x.shape
    HW = H * W
    inv_hw = 1.0 / HW

    def conv3x3(a_bf16, w_ref):
        """3x3 'same' conv with reflection padding.
        a_bf16: (H, W, C) bf16.  Returns (H*W, C) f32.
        Conv bias omitted: exactly cancelled by the affine-free InstanceNorm."""
        # Reflection pad along H only (outer axis -> cheap concat).
        ah = jnp.concatenate([a_bf16[1:2], a_bf16, a_bf16[H - 2:H - 1]], axis=0)   # (H+2, W, C)
        # kw-shifted slabs, built once per conv (W is the sublane axis); the
        # misaligned shifts are hoisted out of the 3x3 tap loop.
        # TODO(synk): replace with pltpu.roll(ah, +/-1, axis=1) + one-column
        # edge fixup once 3-D sublane rotate is verified on the target jax.
        left = jnp.concatenate([ah[:, 1:2], ah[:, :W - 1]], axis=1)                # kw = 0
        right = jnp.concatenate([ah[:, 1:], ah[:, W - 2:W - 1]], axis=1)           # kw = 2
        # Fold the 3 kw taps into the contraction dim: 3 dots with K = 3*C.
        # TODO(synk): on v7x prefer 9 dots with K=C (skips the 3C-wide pw
        # buffer, which is ~6 MiB bf16 at 64x64x256); keep K=3C on v5e/v6e.
        pw = jnp.concatenate([left, ah, right], axis=-1)                           # (H+2, W, 3C)
        pw = pw.reshape((H + 2) * W, 3 * C)        # free relayout when W % 8 == 0
        acc = None
        for kh in range(3):
            patch = pw[kh * W: kh * W + HW]        # aligned row window, (H*W, 3C)
            tap = jnp.dot(patch, w_ref[kh], preferred_element_type=jnp.float32)
            acc = tap if acc is None else acc + tap   # acc initialized from first dot
        return acc                                  # (H*W, C) f32

    def in_stats(a_flat):
        # Single reduction pass: per-channel sum and sum-of-squares, f32.
        s = jnp.sum(a_flat, axis=0, keepdims=True)                 # (1, C)
        s2 = jnp.sum(a_flat * a_flat, axis=0, keepdims=True)       # (1, C)
        mean = s * inv_hw
        # Biased variance via E[x^2] - mean^2 in f32; activations here are O(1)
        # so cancellation is benign.  eps matches PyTorch InstanceNorm2d.
        var = s2 * inv_hw - mean * mean
        return mean, jax.lax.rsqrt(var + EPS)

    # conv1 -> InstanceNorm -> ReLU  (IN + ReLU + bf16 cast fused into one pass)
    a1 = conv3x3(x.astype(jnp.bfloat16), w1_ref)
    m1, r1 = in_stats(a1)
    h_bf = jnp.maximum((a1 - m1) * r1, 0.0).astype(jnp.bfloat16).reshape(H, W, C)
    # TODO(synk): use_dropout branch (nn.Dropout(0.5)) not implemented (use_dropout=False here).

    # conv2 -> InstanceNorm -> residual add
    a2 = conv3x3(h_bf, w2_ref)
    m2, r2 = in_stats(a2)
    h2 = ((a2 - m2) * r2).reshape(H, W, C)

    o_ref[0] = (x + h2).astype(o_ref.dtype)


def pack_weights(w):
    """(Cout, Cin, 3, 3) -> (3, 3*Cin, Cout) bf16, kh major; rows ordered (kw, cin)."""
    cout, cin = w.shape[0], w.shape[1]
    return jnp.transpose(w, (2, 3, 1, 0)).reshape(3, 3 * cin, cout).astype(jnp.bfloat16)


def _vmem_limit_bytes():
    # ~80% of per-core VMEM (headroom for compiler scratch + pipeline buffers),
    # capped at 100 MiB on 128 MiB parts (v5e/v6e); ~51 MiB on the 64 MiB v7x.
    cap = None
    try:
        info = pltpu.get_tpu_info()
        cap = getattr(info, "vmem_capacity_bytes", None)
    except Exception:
        cap = None
    if cap is None:
        return 64 * 1024 * 1024
    return min(int(cap * 0.8), 100 * 1024 * 1024)


def resnet_block_nhwc(x, w1_packed, w2_packed):
    """Primary API: x (N, H, W, C) float32 NHWC; weights from pack_weights().
    Conv biases are not taken — they are cancelled exactly by the affine-free
    InstanceNorm that follows each conv.  Chain blocks in NHWC; convert to/from
    NCHW once at the ends of the chain."""
    N, H, W, C = x.shape
    # TODO(synk): request single-buffered weights (pipeline_mode=pl.Buffered(1),
    # ~2.25 MiB VMEM saved at C=256) once Buffered(1) support is confirmed for
    # the deployed jax version; the previous broad try/except fallback masked
    # real compile/runtime errors and was removed.
    w_spec = pl.BlockSpec((3, 3 * C, C), lambda n: (0, 0, 0))
    return pl.pallas_call(
        resnet_block_kernel,
        out_shape=jax.ShapeDtypeStruct((N, H, W, C), x.dtype),
        grid_spec=pltpu.PrefetchScalarGridSpec(
            num_scalar_prefetch=0,
            grid=(N,),
            in_specs=[
                pl.BlockSpec((1, H, W, C), lambda n: (n, 0, 0, 0)),
                w_spec,
                w_spec,
            ],
            out_specs=pl.BlockSpec((1, H, W, C), lambda n: (n, 0, 0, 0)),
        ),
        compiler_params=pltpu.CompilerParams(
            dimension_semantics=("parallel",),
            vmem_limit_bytes=_vmem_limit_bytes(),
        ),
    )(x, w1_packed, w2_packed)


def resnet_block(x_nchw, w1, b1, w2, b2):
    """PyTorch-parity convenience wrapper (NCHW in/out).  For a chain of blocks
    use resnet_block_nhwc directly and convert layouts once at the ends."""
    del b1, b2  # cancelled by InstanceNorm(affine=False)
    x = jnp.transpose(x_nchw, (0, 2, 3, 1))
    out = resnet_block_nhwc(x, pack_weights(w1), pack_weights(w2))
    return jnp.transpose(out, (0, 3, 1, 2))


def _reference(x_nchw, w1, b1, w2, b2):
    """Pure-JAX f32 reference (NCHW), matching the PyTorch module exactly."""
    def conv(x, w, b):
        xp = jnp.pad(x, ((0, 0), (0, 0), (1, 1), (1, 1)), mode="reflect")
        y = jax.lax.conv_general_dilated(
            xp, w, window_strides=(1, 1), padding="VALID",
            dimension_numbers=("NCHW", "OIHW", "NCHW"))
        return y + b[None, :, None, None]

    def inorm(x):
        mean = jnp.mean(x, axis=(2, 3), keepdims=True)
        var = jnp.mean((x - mean) ** 2, axis=(2, 3), keepdims=True)
        return (x - mean) * jax.lax.rsqrt(var + EPS)

    h = jnp.maximum(inorm(conv(x_nchw, w1, b1)), 0.0)
    h = inorm(conv(h, w2, b2))
    return x_nchw + h


if __name__ == "__main__":
    N, C, H, W = 2, 4, 16, 16
    key = jax.random.PRNGKey(0)
    kx, kw1, kb1, kw2, kb2 = jax.random.split(key, 5)

    x = jax.random.normal(kx, (N, C, H, W), jnp.float32)
    fan_in = C * 3 * 3
    w1 = jax.random.normal(kw1, (C, C, 3, 3), jnp.float32) / jnp.sqrt(fan_in)
    b1 = jax.random.normal(kb1, (C,), jnp.float32) * 0.01
    w2 = jax.random.normal(kw2, (C, C, 3, 3), jnp.float32) / jnp.sqrt(fan_in)
    b2 = jax.random.normal(kb2, (C,), jnp.float32) * 0.01

    # NHWC end-to-end: convert once at the ends (this is how a chain of 9
    # CycleGAN blocks would be driven — one transpose pair total, not per block).
    x_nhwc = jnp.transpose(x, (0, 2, 3, 1))
    out_nhwc = resnet_block_nhwc(x_nhwc, pack_weights(w1), pack_weights(w2))
    out_nhwc = jax.block_until_ready(out_nhwc)
    out = jnp.transpose(out_nhwc, (0, 3, 1, 2))

    ref = _reference(x, w1, b1, w2, b2)
    assert out.shape == (N, C, H, W)
    # bf16 matmul operands (f32 accumulation) through two conv + instance-norm
    # stages -> loosened tolerance vs the all-f32 reference.
    err = jnp.abs(out - ref)
    assert jnp.max(err) < 1.5e-1, "max mismatch vs reference"
    assert jnp.mean(err) < 3e-2, "mean mismatch vs reference"

    print("KERNEL_OK")
</pallas_src>

<mosaic_0001>
module attributes {stable_mosaic.version = 11 : i64} {
  func.func @resnet_block_kernel(%arg0: i32, %arg1: memref<1x16x16x4xf32, #tpu.memory_space<vmem>>, %arg2: memref<3x12x4xbf16, #tpu.memory_space<vmem>>, %arg3: memref<3x12x4xbf16, #tpu.memory_space<vmem>>, %arg4: memref<1x16x16x4xf32, #tpu.memory_space<vmem>>) attributes {dimension_semantics = [#tpu.dimension_semantics<parallel>], iteration_bounds = array<i64: 2>, scalar_prefetch = 0 : i64, scratch_operands = 0 : i64, tpu.core_type = #tpu.core_type<tc>, window_params = [{transform_indices = @transform_0, window_bounds = array<i64: 1, 16, 16, 4>}, {pipeline_mode = #tpu.pipeline_mode<synchronous>, transform_indices = @transform_1, window_bounds = array<i64: 3, 12, 4>}, {pipeline_mode = #tpu.pipeline_mode<synchronous>, transform_indices = @transform_2, window_bounds = array<i64: 3, 12, 4>}, {transform_indices = @transform_3, window_bounds = array<i64: 1, 16, 16, 4>}]} {
    %c0 = arith.constant 0 : index
    %c0_0 = arith.constant 0 : index
    %c0_1 = arith.constant 0 : index
    %c0_2 = arith.constant 0 : index
    %0 = vector.load %arg1[%c0, %c0_0, %c0_1, %c0_2] : memref<1x16x16x4xf32, #tpu.memory_space<vmem>>, vector<1x16x16x4xf32>
    %1 = vector.shape_cast %0 : vector<1x16x16x4xf32> to vector<16x16x4xf32>
    %2 = arith.truncf %1 : vector<16x16x4xf32> to vector<16x16x4xbf16>
    %3 = vector.extract_strided_slice %2 {offsets = [1, 0, 0], sizes = [1, 16, 4], strides = [1, 1, 1]} : vector<16x16x4xbf16> to vector<1x16x4xbf16>
    %4 = vector.extract_strided_slice %2 {offsets = [14, 0, 0], sizes = [1, 16, 4], strides = [1, 1, 1]} : vector<16x16x4xbf16> to vector<1x16x4xbf16>
    %5 = tpu.concatenate %3, %2, %4 in 0 : vector<1x16x4xbf16>, vector<16x16x4xbf16>, vector<1x16x4xbf16> -> vector<18x16x4xbf16>
    %6 = vector.extract_strided_slice %5 {offsets = [0, 1, 0], sizes = [18, 1, 4], strides = [1, 1, 1]} : vector<18x16x4xbf16> to vector<18x1x4xbf16>
    %7 = vector.extract_strided_slice %5 {offsets = [0, 0, 0], sizes = [18, 15, 4], strides = [1, 1, 1]} : vector<18x16x4xbf16> to vector<18x15x4xbf16>
    %8 = tpu.concatenate %6, %7 in 1 : vector<18x1x4xbf16>, vector<18x15x4xbf16> -> vector<18x16x4xbf16>
    %9 = vector.extract_strided_slice %5 {offsets = [0, 1, 0], sizes = [18, 15, 4], strides = [1, 1, 1]} : vector<18x16x4xbf16> to vector<18x15x4xbf16>
    %10 = vector.extract_strided_slice %5 {offsets = [0, 14, 0], sizes = [18, 1, 4], strides = [1, 1, 1]} : vector<18x16x4xbf16> to vector<18x1x4xbf16>
    %11 = tpu.concatenate %9, %10 in 1 : vector<18x15x4xbf16>, vector<18x1x4xbf16> -> vector<18x16x4xbf16>
    %12 = tpu.concatenate %8, %5, %11 in 2 : vector<18x16x4xbf16>, vector<18x16x4xbf16>, vector<18x16x4xbf16> -> vector<18x16x12xbf16>
    %13 = vector.shape_cast %12 : vector<18x16x12xbf16> to vector<288x12xbf16>
    %14 = vector.extract_strided_slice %13 {offsets = [0, 0], sizes = [256, 12], strides = [1, 1]} : vector<288x12xbf16> to vector<256x12xbf16>
    %c0_3 = arith.constant 0 : index
    %c0_4 = arith.constant 0 : index
    %c0_5 = arith.constant 0 : index
    %15 = vector.load %arg2[%c0_3, %c0_4, %c0_5] : memref<3x12x4xbf16, #tpu.memory_space<vmem>>, vector<1x12x4xbf16>
    %16 = vector.shape_cast %15 : vector<1x12x4xbf16> to vector<12x4xbf16>
    %cst = arith.constant dense<0.000000e+00> : vector<256x4xf32>
    %17 = tpu.matmul %14, %16, %cst {dimension_numbers = #tpu.dot_dimension_numbers<[1], [0], [0], [1], [0, 0, 1, 1], [], []>} : vector<256x12xbf16>, vector<12x4xbf16>, vector<256x4xf32> -> vector<256x4xf32>
    %18 = vector.extract_strided_slice %13 {offsets = [16, 0], sizes = [256, 12], strides = [1, 1]} : vector<288x12xbf16> to vector<256x12xbf16>
    %c1 = arith.constant 1 : index
    %c0_6 = arith.constant 0 : index
    %c0_7 = arith.constant 0 : index
    %19 = vector.load %arg2[%c1, %c0_6, %c0_7] : memref<3x12x4xbf16, #tpu.memory_space<vmem>>, vector<1x12x4xbf16>
    %20 = vector.shape_cast %19 : vector<1x12x4xbf16> to vector<12x4xbf16>
    %cst_8 = arith.constant dense<0.000000e+00> : vector<256x4xf32>
    %21 = tpu.matmul %18, %20, %cst_8 {dimension_numbers = #tpu.dot_dimension_numbers<[1], [0], [0], [1], [0, 0, 1, 1], [], []>} : vector<256x12xbf16>, vector<12x4xbf16>, vector<256x4xf32> -> vector<256x4xf32>
    %22 = arith.addf %17, %21 : vector<256x4xf32>
    %23 = vector.extract_strided_slice %13 {offsets = [32, 0], sizes = [256, 12], strides = [1, 1]} : vector<288x12xbf16> to vector<256x12xbf16>
    %c2 = arith.constant 2 : index
    %c0_9 = arith.constant 0 : index
    %c0_10 = arith.constant 0 : index
    %24 = vector.load %arg2[%c2, %c0_9, %c0_10] : memref<3x12x4xbf16, #tpu.memory_space<vmem>>, vector<1x12x4xbf16>
    %25 = vector.shape_cast %24 : vector<1x12x4xbf16> to vector<12x4xbf16>
    %cst_11 = arith.constant dense<0.000000e+00> : vector<256x4xf32>
    %26 = tpu.matmul %23, %25, %cst_11 {dimension_numbers = #tpu.dot_dimension_numbers<[1], [0], [0], [1], [0, 0, 1, 1], [], []>} : vector<256x12xbf16>, vector<12x4xbf16>, vector<256x4xf32> -> vector<256x4xf32>
    %27 = arith.addf %22, %26 : vector<256x4xf32>
    %cst_12 = arith.constant dense<0.000000e+00> : vector<4xf32>
    %28 = vector.multi_reduction <add>, %27, %cst_12 [0] : vector<256x4xf32> to vector<4xf32>
    %29 = vector.shape_cast %28 : vector<4xf32> to vector<1x4xf32>
    %30 = arith.mulf %27, %27 : vector<256x4xf32>
    %cst_13 = arith.constant dense<0.000000e+00> : vector<4xf32>
    %31 = vector.multi_reduction <add>, %30, %cst_13 [0] : vector<256x4xf32> to vector<4xf32>
    %32 = vector.shape_cast %31 : vector<4xf32> to vector<1x4xf32>
    %cst_14 = arith.constant 3.906250e-03 : f32
    %33 = vector.broadcast %cst_14 : f32 to vector<1x4xf32>
    %34 = arith.mulf %29, %33 : vector<1x4xf32>
    %cst_15 = arith.constant 3.906250e-03 : f32
    %35 = vector.broadcast %cst_15 : f32 to vector<1x4xf32>
    %36 = arith.mulf %32, %35 : vector<1x4xf32>
    %37 = arith.mulf %34, %34 : vector<1x4xf32>
    %38 = arith.subf %36, %37 : vector<1x4xf32>
    %cst_16 = arith.constant 9.99999974E-6 : f32
    %39 = vector.broadcast %cst_16 : f32 to vector<1x4xf32>
    %40 = arith.addf %38, %39 : vector<1x4xf32>
    %41 = math.rsqrt %40 : vector<1x4xf32>
    %42 = vector.broadcast %34 : vector<1x4xf32> to vector<256x4xf32>
    %43 = arith.subf %27, %42 : vector<256x4xf32>
    %44 = vector.broadcast %41 : vector<1x4xf32> to vector<256x4xf32>
    %45 = arith.mulf %43, %44 : vector<256x4xf32>
    %cst_17 = arith.constant 0.000000e+00 : f32
    %46 = vector.broadcast %cst_17 : f32 to vector<256x4xf32>
    %47 = arith.maximumf %45, %46 : vector<256x4xf32>
    %48 = arith.truncf %47 : vector<256x4xf32> to vector<256x4xbf16>
    %49 = vector.shape_cast %48 : vector<256x4xbf16> to vector<16x16x4xbf16>
    %50 = vector.extract_strided_slice %49 {offsets = [1, 0, 0], sizes = [1, 16, 4], strides = [1, 1, 1]} : vector<16x16x4xbf16> to vector<1x16x4xbf16>
    %51 = vector.extract_strided_slice %49 {offsets = [14, 0, 0], sizes = [1, 16, 4], strides = [1, 1, 1]} : vector<16x16x4xbf16> to vector<1x16x4xbf16>
    %52 = tpu.concatenate %50, %49, %51 in 0 : vector<1x16x4xbf16>, vector<16x16x4xbf16>, vector<1x16x4xbf16> -> vector<18x16x4xbf16>
    %53 = vector.extract_strided_slice %52 {offsets = [0, 1, 0], sizes = [18, 1, 4], strides = [1, 1, 1]} : vector<18x16x4xbf16> to vector<18x1x4xbf16>
    %54 = vector.extract_strided_slice %52 {offsets = [0, 0, 0], sizes = [18, 15, 4], strides = [1, 1, 1]} : vector<18x16x4xbf16> to vector<18x15x4xbf16>
    %55 = tpu.concatenate %53, %54 in 1 : vector<18x1x4xbf16>, vector<18x15x4xbf16> -> vector<18x16x4xbf16>
    %56 = vector.extract_strided_slice %52 {offsets = [0, 1, 0], sizes = [18, 15, 4], strides = [1, 1, 1]} : vector<18x16x4xbf16> to vector<18x15x4xbf16>
    %57 = vector.extract_strided_slice %52 {offsets = [0, 14, 0], sizes = [18, 1, 4], strides = [1, 1, 1]} : vector<18x16x4xbf16> to vector<18x1x4xbf16>
    %58 = tpu.concatenate %56, %57 in 1 : vector<18x15x4xbf16>, vector<18x1x4xbf16> -> vector<18x16x4xbf16>
    %59 = tpu.concatenate %55, %52, %58 in 2 : vector<18x16x4xbf16>, vector<18x16x4xbf16>, vector<18x16x4xbf16> -> vector<18x16x12xbf16>
    %60 = vector.shape_cast %59 : vector<18x16x12xbf16> to vector<288x12xbf16>
    %61 = vector.extract_strided_slice %60 {offsets = [0, 0], sizes = [256, 12], strides = [1, 1]} : vector<288x12xbf16> to vector<256x12xbf16>
    %c0_18 = arith.constant 0 : index
    %c0_19 = arith.constant 0 : index
    %c0_20 = arith.constant 0 : index
    %62 = vector.load %arg3[%c0_18, %c0_19, %c0_20] : memref<3x12x4xbf16, #tpu.memory_space<vmem>>, vector<1x12x4xbf16>
    %63 = vector.shape_cast %62 : vector<1x12x4xbf16> to vector<12x4xbf16>
    %cst_21 = arith.constant dense<0.000000e+00> : vector<256x4xf32>
    %64 = tpu.matmul %61, %63, %cst_21 {dimension_numbers = #tpu.dot_dimension_numbers<[1], [0], [0], [1], [0, 0, 1, 1], [], []>} : vector<256x12xbf16>, vector<12x4xbf16>, vector<256x4xf32> -> vector<256x4xf32>
    %65 = vector.extract_strided_slice %60 {offsets = [16, 0], sizes = [256, 12], strides = [1, 1]} : vector<288x12xbf16> to vector<256x12xbf16>
    %c1_22 = arith.constant 1 : index
    %c0_23 = arith.constant 0 : index
    %c0_24 = arith.constant 0 : index
    %66 = vector.load %arg3[%c1_22, %c0_23, %c0_24] : memref<3x12x4xbf16, #tpu.memory_space<vmem>>, vector<1x12x4xbf16>
    %67 = vector.shape_cast %66 : vector<1x12x4xbf16> to vector<12x4xbf16>
    %cst_25 = arith.constant dense<0.000000e+00> : vector<256x4xf32>
    %68 = tpu.matmul %65, %67, %cst_25 {dimension_numbers = #tpu.dot_dimension_numbers<[1], [0], [0], [1], [0, 0, 1, 1], [], []>} : vector<256x12xbf16>, vector<12x4xbf16>, vector<256x4xf32> -> vector<256x4xf32>
    %69 = arith.addf %64, %68 : vector<256x4xf32>
    %70 = vector.extract_strided_slice %60 {offsets = [32, 0], sizes = [256, 12], strides = [1, 1]} : vector<288x12xbf16> to vector<256x12xbf16>
    %c2_26 = arith.constant 2 : index
    %c0_27 = arith.constant 0 : index
    %c0_28 = arith.constant 0 : index
    %71 = vector.load %arg3[%c2_26, %c0_27, %c0_28] : memref<3x12x4xbf16, #tpu.memory_space<vmem>>, vector<1x12x4xbf16>
    %72 = vector.shape_cast %71 : vector<1x12x4xbf16> to vector<12x4xbf16>
    %cst_29 = arith.constant dense<0.000000e+00> : vector<256x4xf32>
    %73 = tpu.matmul %70, %72, %cst_29 {dimension_numbers = #tpu.dot_dimension_numbers<[1], [0], [0], [1], [0, 0, 1, 1], [], []>} : vector<256x12xbf16>, vector<12x4xbf16>, vector<256x4xf32> -> vector<256x4xf32>
    %74 = arith.addf %69, %73 : vector<256x4xf32>
    %cst_30 = arith.constant dense<0.000000e+00> : vector<4xf32>
    %75 = vector.multi_reduction <add>, %74, %cst_30 [0] : vector<256x4xf32> to vector<4xf32>
    %76 = vector.shape_cast %75 : vector<4xf32> to vector<1x4xf32>
    %77 = arith.mulf %74, %74 : vector<256x4xf32>
    %cst_31 = arith.constant dense<0.000000e+00> : vector<4xf32>
    %78 = vector.multi_reduction <add>, %77, %cst_31 [0] : vector<256x4xf32> to vector<4xf32>
    %79 = vector.shape_cast %78 : vector<4xf32> to vector<1x4xf32>
    %cst_32 = arith.constant 3.906250e-03 : f32
    %80 = vector.broadcast %cst_32 : f32 to vector<1x4xf32>
    %81 = arith.mulf %76, %80 : vector<1x4xf32>
    %cst_33 = arith.constant 3.906250e-03 : f32
    %82 = vector.broadcast %cst_33 : f32 to vector<1x4xf32>
    %83 = arith.mulf %79, %82 : vector<1x4xf32>
    %84 = arith.mulf %81, %81 : vector<1x4xf32>
    %85 = arith.subf %83, %84 : vector<1x4xf32>
    %cst_34 = arith.constant 9.99999974E-6 : f32
    %86 = vector.broadcast %cst_34 : f32 to vector<1x4xf32>
    %87 = arith.addf %85, %86 : vector<1x4xf32>
    %88 = math.rsqrt %87 : vector<1x4xf32>
    %89 = vector.broadcast %81 : vector<1x4xf32> to vector<256x4xf32>
    %90 = arith.subf %74, %89 : vector<256x4xf32>
    %91 = vector.broadcast %88 : vector<1x4xf32> to vector<256x4xf32>
    %92 = arith.mulf %90, %91 : vector<256x4xf32>
    %93 = vector.shape_cast %92 : vector<256x4xf32> to vector<16x16x4xf32>
    %94 = arith.addf %1, %93 : vector<16x16x4xf32>
    %c0_35 = arith.constant 0 : index
    %c0_36 = arith.constant 0 : index
    %c0_37 = arith.constant 0 : index
    %c0_38 = arith.constant 0 : index
    %95 = vector.load %arg4[%c0_35, %c0_36, %c0_37, %c0_38] : memref<1x16x16x4xf32, #tpu.memory_space<vmem>>, vector<1x16x16x4xf32>
    %96 = vector.shape_cast %95 : vector<1x16x16x4xf32> to vector<16x16x4xf32>
    %97 = vector.shape_cast %94 : vector<16x16x4xf32> to vector<1x16x16x4xf32>
    tpu.vector_store %arg4[%c0_35, %c0_36, %c0_37, %c0_38], %97 {strides = array<i32>} : memref<1x16x16x4xf32, #tpu.memory_space<vmem>>, vector<1x16x16x4xf32>,
    return
  }
  func.func @transform_0(%arg0: i32) -> (i32, i32, i32, i32) {
    %c0_i32 = arith.constant 0 : i32
    %c0_i32_0 = arith.constant 0 : i32
    %c0_i32_1 = arith.constant 0 : i32
    %c0_i32_2 = arith.constant 0 : i32
    return %arg0, %c0_i32, %c0_i32_0, %c0_i32_1 : i32, i32, i32, i32
  }
  func.func @transform_1(%arg0: i32) -> (i32, i32, i32) {
    %c0_i32 = arith.constant 0 : i32
    %c0_i32_0 = arith.constant 0 : i32
    %c0_i32_1 = arith.constant 0 : i32
    %c0_i32_2 = arith.constant 0 : i32
    return %c0_i32, %c0_i32_0, %c0_i32_1 : i32, i32, i32
  }
  func.func @transform_2(%arg0: i32) -> (i32, i32, i32) {
    %c0_i32 = arith.constant 0 : i32
    %c0_i32_0 = arith.constant 0 : i32
    %c0_i32_1 = arith.constant 0 : i32
    %c0_i32_2 = arith.constant 0 : i32
    return %c0_i32, %c0_i32_0, %c0_i32_1 : i32, i32, i32
  }
  func.func @transform_3(%arg0: i32) -> (i32, i32, i32, i32) {
    %c0_i32 = arith.constant 0 : i32
    %c0_i32_0 = arith.constant 0 : i32
    %c0_i32_1 = arith.constant 0 : i32
    %c0_i32_2 = arith.constant 0 : i32
    return %arg0, %c0_i32, %c0_i32_0, %c0_i32_1 : i32, i32, i32, i32
  }
}

</mosaic_0001>

<bundles_post_ra>
// kernel: tpu_custom_call.1
= control target key start
LH: loop header
LB: loop body
LE: loop exit
PB: predicated region body
PF: predicated region fallthrough
CT: control target
= control target key end

     0   :  { %8 = vsyncpa [#allocation3], 0  ;;  %s6004_s0 = inlined_call_operand.hbm [shape: f32[2,16,16,4], index: 0, kind: input, shape index: {}]   ;;  %s6005_s1 = inlined_call_operand.hbm [shape: bf16[3,12,4], index: 1, kind: input, shape index: {}]   ;;  %s6006_s2 = inlined_call_operand.hbm [shape: bf16[3,12,4], index: 2, kind: input, shape index: {}]   ;;  %s6007_s3 = inlined_call_operand.hbm [shape: f32[2,16,16,4], index: 3, kind: output, shape index: {}]  }
   0x1   :  { %10 = vsyncpa [#allocation3 + $0x1], 0 }
   0x2   :  { %11 = vsyncpa [#allocation6], 0 }
   0x3   :  { %12 = vsyncpa [#allocation4], 0 }
   0x4   :  { %14 = vsyncpa [#allocation4 + $0x1], 0  ;;  %s3832_s12 = smov 0   ;;  %s3834_s13 = smov 0  }
   0x5   :  { %s3836_s14 = smov 0   ;;  %s3838_s15 = smov 0  }
   0x6 LB: > { %s3853_s16 = sadd.s32 4294967295, %s3799_s15   ;;  %s2965_s17 = sadd.s32 4294967294, %s3799_s15   ;;  %s3799_s15 = sphi %s3838_s15, %s6041_s15   ;;  %s3795_s14 = sphi %s3836_s14, %s6040_s14   ;;  %s3791_s13 = sphi %s3834_s13, %s6039_s13   ;;  %s3787_s12 = sphi %s3832_s12, %s6038_s12  }
   0x7   : > { %p40_p0 = scmp.ne.s32.totalorder %s3791_s13, %s3787_s12  ;;  %p6008_p1 = scmp.eq.s32.totalorder %s3853_s16, 0 }
   0x8   : > { %p112_p3 = scmp.eq.s32.totalorder %s2965_s17, 1  ;;  %p2966_p5 = scmp.ge.s32.totalorder %s3799_s15, 1 }
   0x9   : > { %p3862_p4 = por %p6008_p1, %p40_p0  ;;  %p119_p7 = scmp.lt.s32.totalorder %s3799_s15, 3 }
   0xa   : > { %p3867_p6 = por %p112_p3, %p40_p0  ;;  %s3801_s21 = smov [#allocation5]  }
   0xb   : > { %s6011_s18 = scalar_select %p3862_p4, 1, 0 }
   0xc   : > { %s6012_s19 = scalar_select %p3867_p6, 1, 0 }
   0xd   : > { %p3872_p8 = pnand %p2966_p5, %p119_p7  ;;  %s131_s22 = sshll.u32 %s3801_s21, 4  ;;  %s3876_s22 = int_to_ptr.vmem [resolvable:$true] %s131_s22 }
   0xe   : > { %s3802_s24 = smov [#allocation7]   ;;  %s3643_s28 = scalar_lea.hbm %s6005_s1, 384 }
   0xf   : > { %p3539_p9 = pneg %p3872_p8  ;;  %s144_s25 = sshll.u32 %s3802_s24, 4  ;;  %s3887_s25 = int_to_ptr.vmem [resolvable:$true] %s144_s25 }
  0x10   : > { %p3644_p12 = scmp.ne.s32.totalorder %s6005_s1, %s3643_s28  ;;  %p3650_p5 = scmp.lt.u32.totalorder %s3643_s28, %s6005_s1 }
  0x11   : > { %p3883_p11 = pnand %p3539_p9, %p6008_p1 }
  0x13   : > { %p3645_p13 = pneg %p3883_p11 }
  0x15   : > { %p3646_p0 = pnand %p3645_p13, %p3644_p12 }
  0x17   : > { %p3647_p3 = pneg %p3646_p0 }
  0x19   : > { %p3652_p7 = pnand %p3650_p5, %p3647_p3 }
  0x1b   : > { %3655 = shalt.err (!%p3652_p7)
}
  0x1c   : > { %s3656_s6 = scalar_lea.vmem %s3876_s22, 384  ;;  %p3664_p2 = scmp.lt.s32.totalorder %s3876_s22, %s3876_s22 }
  0x1d   : > { %p3657_p9 = scmp.ne.s32.totalorder %s3876_s22, %s3656_s6  ;;  %p3665_p12 = scmp.lt.s32.totalorder %s3656_s6, %s3656_s6 }
  0x1f   : > { %p3659_p10 = pnand %p3657_p9, %p3645_p13  ;;  %p3666_p0 = por %p3665_p12, %p3664_p2 }
  0x21   : > { %p3660_p1 = pneg %p3659_p10 }
  0x23   : > { %p3667_p6 = pnand %p3666_p0, %p3660_p1 }
  0x25   : > { %3670 = shalt.err (!%p3667_p6)
}
  0x26   : > { %s3803_s7 = smov 64   ;;  %s3804_s8 = smov 4  }
  0x27   : > { %3542 = dma.hbm_to_vmem [thread:$0]  (!%p3883_p11), %s6005_s1, 384, %s3876_s22, [#allocation6], %s3803_s7, %s3803_s7, %s3804_s8  }
  0x28   : > { %s3671_s21 = scalar_lea.hbm %s6006_s2, 384 }
  0x29   : > { %p3672_p2 = scmp.ne.s32.totalorder %s6006_s2, %s3671_s21  ;;  %p3678_p10 = scmp.lt.u32.totalorder %s3671_s21, %s6006_s2 }
  0x2b   : > { %p3674_p1 = pnand %p3672_p2, %p3645_p13 }
  0x2d   : > { %p3675_p6 = pneg %p3674_p1 }
  0x2f   : > { %p3680_p3 = pnand %p3678_p10, %p3675_p6 }
  0x31   : > { %3683 = shalt.err (!%p3680_p3)
}
  0x32   : > { %s3684_s22 = scalar_lea.vmem %s3887_s25, 384  ;;  %p3692_p12 = scmp.lt.s32.totalorder %s3887_s25, %s3887_s25 }
  0x33   : > { %p3685_p5 = scmp.ne.s32.totalorder %s3887_s25, %s3684_s22  ;;  %p3693_p0 = scmp.lt.s32.totalorder %s3684_s22, %s3684_s22 }
  0x35   : > { %p3687_p7 = pnand %p3685_p5, %p3645_p13  ;;  %p3694_p2 = por %p3693_p0, %p3692_p12 }
  0x37   : > { %p3688_p9 = pneg %p3687_p7 }
  0x39   : > { %p3695_p1 = pnand %p3694_p2, %p3688_p9 }
  0x3b   : > { %3698 = shalt.err (!%p3695_p1)
}
  0x3c   : > { %3545 = dma.hbm_to_vmem [thread:$0]  (!%p3883_p11), %s6006_s2, 384, %s3887_s25, [#allocation6], %s3803_s7, %s3803_s7, %s3804_s8  }
  0x3d   : > { %s3942_s4 = sadd.s32 1, %s3799_s15   ;;  %s27_s23 = sadd.s32 1, %s3795_s14 }
  0x3e   : > { %s24_s5 = ssub.s32 %s3799_s15, %s3942_s4  ;;  %p34_p13 = scmp.ne.s32.totalorder %s3795_s14, %s3791_s13 }
  0x3f   : > { %p25_p6 = scmp.eq.s32.totalorder %s24_s5, 0  ;;  %p35_p10 = scmp.eq.s32.totalorder %s3799_s15, 0 }
  0x40   : > { %p6015_p3 = scmp.eq.s32.totalorder %s3853_s16, 1  ;;  %p3556_p7 = scmp.lt.s32.totalorder %s3799_s15, 2 }
  0x41   : > { %s3958_s9 = scalar_select %p25_p6, %s3795_s14, %s27_s23  }
  0x42   : > { %p3952_p5 = por %p6015_p3, %p34_p13  ;;  %p36_p9 = por %p35_p10, %p34_p13 }
  0x43   : > { %s158_s10 = sand.u32 1, %s3795_s14   ;;  %s3085_s25 = sshll.u32 %s3799_s15, 12 }
  0x44   : > { %s6016_s6 = scalar_select %p3952_p5, 1, 0 }
  0x45   : > { %s2970_s11 = sshll.u32 %s158_s10, 8  ;;  %s3965_s17 = scalar_lea.hbm %s6004_s0, %s3085_s25 }
  0x46   : > { %s162_s21 = scalar_lea.vmem [#allocation2], %s2970_s11  ;;  %p3969_p11 = pnand %p3556_p7, %p36_p9 }
  0x47   : > { %s169_s24 = sshll.u32 %s162_s21, 4  ;;  %s3973_s27 = scalar_lea.sflag [#allocation3], %s158_s10  ;;  %s3967_s24 = int_to_ptr.vmem [resolvable:$true] %s169_s24 }
  0x48   : > { %s3699_s28 = scalar_lea.hbm %s3965_s17, 4096  ;;  %p3701_p0 = pneg %p3969_p11 }
  0x49   : > { %p3700_p12 = scmp.ne.s32.totalorder %s3965_s17, %s3699_s28  ;;  %s3704_s30 = scalar_lea.hbm %s6004_s0, 8192 }
  0x4a   : > { %p3705_p13 = scmp.lt.u32.totalorder %s3965_s17, %s6004_s0  ;;  %p3706_p6 = scmp.lt.u32.totalorder %s3704_s30, %s3699_s28 }
  0x4b   : > { %p3702_p2 = pnand %p3701_p0, %p3700_p12  ;;  %p3708_p3 = scmp.lt.u32.totalorder %s3699_s28, %s3965_s17 }
  0x4c   : > { %p3707_p10 = por %p3706_p6, %p3705_p13 }
  0x4d   : > { %p3703_p1 = pneg %p3702_p2 }
  0x4e   : > { %p3709_p7 = por %p3708_p3, %p3707_p10 }
  0x50   : > { %p3710_p9 = pnand %p3709_p7, %p3703_p1 }
  0x52   : > { %3713 = shalt.err (!%p3710_p9)
}
  0x53   : > { %s3714_s10 = scalar_lea.vmem %s3967_s24, 4096  ;;  %s3805_s11 = smov [#allocation2]  }
  0x54   : > { %p3715_p12 = scmp.ne.s32.totalorder %s3967_s24, %s3714_s10  ;;  %s3719_s25 = sshll.u32 %s3805_s11, 4  ;;  %s3720_s25 = int_to_ptr.vmem [resolvable:$false] %s3719_s25 }
  0x55   : > { %s3721_s7 = scalar_lea.vmem %s3720_s25, 8192  ;;  %p3722_p4 = scmp.lt.s32.totalorder %s3967_s24, %s3720_s25 }
  0x56   : > { %p3717_p2 = pnand %p3715_p12, %p3701_p0  ;;  %p3723_p13 = scmp.lt.s32.totalorder %s3721_s7, %s3714_s10 }
  0x58   : > { %p3718_p5 = pneg %p3717_p2  ;;  %p3724_p6 = por %p3723_p13, %p3722_p4 }
  0x5a   : > { %p3725_p10 = pnand %p3724_p6, %p3718_p5 }
  0x5c   : > { %3728 = shalt.err (!%p3725_p10)
}
  0x5d   : > { %s3806_s8 = smov 128   ;;  %s3807_s21 = smov 8  }
  0x5e   : > { %3549 = dma.hbm_to_vmem [thread:$0]  (!%p3969_p11), %s3965_s17, 4096, %s3967_s24, %s3973_s27, %s3806_s8, %s3806_s8, %s3807_s21  }
  0x5f   : > { %181 = sbr.rel (%p3872_p8) target bundleno = 1287 (0x507), region = 32  ;;  %s4004_s28 = sand.u32 (!%p3872_p8), 1, %s3791_s13  }
  0x60   : > { %s2974_s22 = sshll.u32 (!%p3872_p8), %s4004_s28, 8  ;;  %s184_s29 = scalar_lea.sflag (!%p3872_p8), [#allocation3], %s4004_s28 }
  0x61   : > { %s4010_s30 = scalar_lea.vmem (!%p3872_p8), [#allocation2], %s2974_s22  ;;  %p6018_p4 = scmp.ne.s32.totalorder (!%p3872_p8), %s6011_s18, 0 }
  0x66   : > { %3774 = dma.done.wait (%p6018_p4), %s184_s29, 4096  }
  0x67   : > { %3776 = vsyncadd (%p6018_p4), %s184_s29, 4294963200  ;;  %p6019_p5 = scmp.eq.s32.totalorder %s3853_s16, 0 }
  0x69   : > { %3778 = dma.done.wait (%p6019_p5), [#allocation6], 768   ;;  %p6020_p8 = pmov %p6019_p5 }
  0x6a   : > { %v219_v0 = vld [vmem:[%s4010_s30] sm:$0xff]  ;;  %v220_v1 = vld [vmem:[%s4010_s30 + $0x8] sm:$0xff]  ;;  %v221_v2 = vld [vmem:[%s4010_s30 + $0x10] sm:$0xff]  ;;  %vm494_vm0 = vcmask 1047552   ;;  %s3808_s18 = smov 4   ;;  %s3809_s20 = smov 8  }
  0x6b   : > { %3780 = vsyncadd (%p6020_p8), [#allocation6], 4294966528  ;;  %v251_v3 = vpack.c.bf16 %v220_v1, %v219_v0  ;;  %v222_v4 = vld [vmem:[%s4010_s30 + $0x18] sm:$0xff]  ;;  %v223_v5 = vld [vmem:[%s4010_s30 + $0x20] sm:$0xff]  ;;  %vm495_vm1 = vsmask.f32 7424 }
  0x6c   : > { %v224_v6 = vld [vmem:[%s4010_s30 + $0x28] sm:$0xff]  ;;  %v252_v7 = vpack.c.bf16 %v222_v4, %v221_v2  ;;  %v225_v9 = vld [vmem:[%s4010_s30 + $0x30] sm:$0xff]  ;;  %v226_v10 = vld [vmem:[%s4010_s30 + $0x38] sm:$0xff]  ;;  %vm734_vm3 = vcmask 1045504   ;;  %vm411_vm4 = vcmask 1040384   ;;  %vm609_vm7 = vcmask 31744  }
  0x6d   : > { %v253_v8 = vpack.c.bf16 %v224_v6, %v223_v5  ;;  %v227_v11 = vld [vmem:[%s4010_s30 + $0x40] sm:$0xff]  ;;  %531 = vrot.lane.b32.xlu0 %v251_v3, %s3808_s18  ;;  %v4030_v12 = vshrl.u32 %v251_v3, 16  ;;  %v4032_v13 = vshll.u32 %v251_v3, 16  ;;  %v254_v14 = vpack.c.bf16 %v226_v10, %v225_v9  ;;  %v228_v15 = vld [vmem:[%s4010_s30 + $0x48] sm:$0xff]  ;;  %v229_v22 = vld [vmem:[%s4010_s30 + $0x50] sm:$0xff]  ;;  %s5815_s17 = scalar_lea.vmem [#allocation8], %s2974_s22 }
  0x6e   : > { %v4035_v16 = vshrl.u32 %v252_v7, 16  ;;  %v4039_v18 = vshll.u32 %v252_v7, 16  ;;  %v255_v21 = vpack.c.bf16 %v228_v15, %v227_v11  ;;  %v230_v23 = vld [vmem:[%s4010_s30 + $0x58] sm:$0xff]  ;;  %vm4047_vm2 = vmand %vm494_vm0, %vm495_vm1  ;;  %v231_v27 = vld [vmem:[%s4010_s30 + $0x60] sm:$0xff]  ;;  %vm412_vm5 = vsmask.f32 256 }
  0x6f   : > { %v4037_v17 = vshrl.u32 %v253_v8, 16  ;;  %v4041_v19 = vshll.u32 %v253_v8, 16  ;;  %v432_v20 = vrot.slane %v4032_v13, 1  ;;  %v232_v28 = vld [vmem:[%s4010_s30 + $0x68] sm:$0xff]  ;;  %v4057_v30 = vshll.u32 %v254_v14, 16  ;;  %v233_v38 = vld [vmem:[%s4010_s30 + $0x70] sm:$0xff]  ;;  %vm4175_vm6 = vmand %vm411_vm4, %vm412_vm5 }
  0x70   : > { %v430_v25 = vrot.slane %v4039_v18, 1  ;;  %v4061_v33 = vshll.u32 %v255_v21, 16  ;;  %v4063_v34 = vpack.c.bf16 %v230_v23, %v229_v22  ;;  %v4068_v36 = vpack.c.bf16 %v232_v28, %v231_v27  ;;  %v234_v39 = vld [vmem:[%s4010_s30 + $0x78] sm:$0xff]  ;;  %v235_v42 = vld [vmem:[%s4010_s30 + $0x80] sm:$0xff]  ;;  %v236_v47 = vld [vmem:[%s4010_s30 + $0x88] sm:$0xff]  ;;  %s3086_s24 = sshll.u32 %s3853_s16, 12 }
  0x71   : > { %v434_v26 = vrot.slane %v4041_v19, 1  ;;  %529 = vrot.lane.b32.xlu0 %v252_v7, %s3808_s18  ;;  %v433_v29 = vor.u32 %v432_v20, %v4030_v12  ;;  %v4071_v37 = vshrl.u32 %v254_v14, 16  ;;  %v436_v41 = vrot.slane %v4057_v30, 1  ;;  %v3601_v48 = vld [vmem:[#allocation5 + $0x8] sm:$0x3f]   ;;  %v237_v51 = vld [vmem:[%s4010_s30 + $0x90] sm:$0xff]  ;;  %s5923_s5 = scalar_lea.hbm %s6007_s3, %s3086_s24 }
  0x72   : > { %v431_v31 = vor.u32 %v430_v25, %v4035_v16  ;;  %v4084_v44 = vshrl.u32 %v255_v21, 16  ;;  %v438_v45 = vrot.slane %v4061_v33, 1  ;;  %v4088_v46 = vshll.u32 %v4063_v34, 16  ;;  %3521 = vmatprep.subr.msk.bf16.mxu0 %vm734_vm3, %v3601_v48  ;;  %v238_v55 = vld [vmem:[%s4010_s30 + $0x98] sm:$0xff]  ;;  %v239_v0 = vld [vmem:[%s4010_s30 + $0xa0] sm:$0xff]  ;;  %v240_v1 = vld [vmem:[%s4010_s30 + $0xa8] sm:$0xff] }
  0x73   : > { %v435_v32 = vor.u32 %v434_v26, %v4037_v17  ;;  %v498_v35 = vsel %vm4047_vm2, %v433_v29, %v4032_v13  ;;  %v4092_v49 = vshll.u32 %v4068_v36, 16  ;;  %v4094_v50 = vpack.c.bf16 %v234_v39, %v233_v38  ;;  %v241_v7 = vld [vmem:[%s4010_s30 + $0xb0] sm:$0xff]  ;;  %v4153_v20 = vld [vmem:[#allocation5] sm:$0x3f]   ;;  %s2873_s26 = sshll.u32 %s5815_s17, 4  ;;  %s2860_s16 = scalar_lea.sflag [#allocation4], %s4004_s28  ;;  %s5943_s26 = int_to_ptr.vmem [resolvable:$true] %s2873_s26 }
  0x74   : > { %579 = vrot.lane.b32.xlu1 %v498_v35, %s3809_s20  ;;  %v497_v40 = vsel %vm4047_vm2, %v431_v31, %v4039_v18  ;;  %v437_v52 = vor.u32 %v436_v41, %v4071_v37  ;;  %v4102_v53 = vshrl.u32 %v4063_v34, 16  ;;  %v4104_v54 = vpack.c.bf16 %v236_v47, %v235_v42  ;;  %v243_v29 = vld [vmem:[%s4010_s30 + $0xc0] sm:$0xff]  ;;  %v244_v31 = vld [vmem:[%s4010_s30 + $0xc8] sm:$0xff]  ;;  %s3729_s10 = scalar_lea.vmem %s5943_s26, 4096  ;;  %p6035_p0 = scmp.ne.s32.totalorder %s6016_s6, 0 }
  0x75   : > { %533 = vrot.lane.b32.xlu0 %v253_v8, %s3808_s18  ;;  %v499_v43 = vsel %vm4047_vm2, %v435_v32, %v4041_v19  ;;  %v439_v56 = vor.u32 %v438_v45, %v4084_v44  ;;  %v4109_v57 = vshrl.u32 %v4068_v36, 16  ;;  %v440_v58 = vrot.slane %v4088_v46, 1  ;;  %v242_v8 = vld [vmem:[%s4010_s30 + $0xb8] sm:$0xff]  ;;  %p3730_p11 = scmp.ne.s32.totalorder %s5943_s26, %s3729_s10  ;;  %s3810_s11 = smov [#allocation8]  }
  0x76   : > { %v442_v59 = vrot.slane %v4092_v49, 1  ;;  %v4114_v60 = vshll.u32 %v4094_v50, 16  ;;  %v500_v61 = vsel %vm4047_vm2, %v437_v52, %v4057_v30  ;;  %v4122_v62 = vshll.u32 %v4104_v54, 16  ;;  %s3733_s25 = sshll.u32 %s3810_s11, 4  ;;  %s3734_s25 = int_to_ptr.vmem [resolvable:$false] %s3733_s25 }
  0x77   : > { %v4124_v63 = vpack.c.bf16 %v238_v55, %v237_v51  ;;  %v501_v2 = vsel %vm4047_vm2, %v439_v56, %v4061_v33  ;;  %v441_v3 = vor.u32 %v440_v58, %v4102_v53  ;;  %v4134_v5 = vshrl.u32 %v4094_v50, 16  ;;  %p3731_p1 = pnand %p3730_p11, %p6035_p0  ;;  %s3735_s7 = scalar_lea.vmem %s3734_s25, 8192 }
  0x78   : > { %577 = vrot.lane.b32.xlu1 %v497_v40, %s3809_s20  ;;  %v443_v4 = vor.u32 %v442_v59, %v4109_v57  ;;  %v444_v6 = vrot.slane %v4114_v60, 1  ;;  %v4140_v9 = vpack.c.bf16 %v240_v1, %v239_v0  ;;  %v4144_v10 = vshrl.u32 %v4104_v54, 16  ;;  %p3736_p7 = scmp.lt.s32.totalorder %s5943_s26, %s3734_s25  ;;  %p3737_p9 = scmp.lt.s32.totalorder %s3735_s7, %s3729_s10 }
  0x79   : > { %581 = vrot.lane.b32.xlu0 %v499_v43, %s3809_s20  ;;  %v446_v11 = vrot.slane %v4122_v62, 1  ;;  %v4151_v15 = vshll.u32 %v4124_v63, 16  ;;  %v4158_v22 = vpack.c.bf16 %v242_v8, %v241_v7  ;;  %v335_v23 = vrot.slane %v4030_v12, 7  ;;  %v245_v7 = vld [vmem:[%s4010_s30 + $0xd0] sm:$0xff]  ;;  %v246_v8 = vld [vmem:[%s4010_s30 + $0xd8] sm:$0xff]  ;;  %p3732_p3 = pneg %p3731_p1 }
  0x7a   : > { %v331_v25 = vrot.slane %v4035_v16, 7  ;;  %v503_v26 = vsel %vm4047_vm2, %v443_v4, %v4092_v49  ;;  %v4166_v27 = vor.u32 %v444_v6, %v4134_v5  ;;  %v4169_v28 = vshrl.u32 %v4140_v9, 16  ;;  %p3738_p12 = por %p3737_p9, %p3736_p7 }
  0x7b   : > { %v736_v35 = vsel %vm734_vm3, %v3601_v48, 0  ;;  %v4183_v38 = vshll.u32 %v4140_v9, 16  ;;  %v4186_v39 = vor.u32 %v4032_v13, %v335_v23  ;;  %v339_v41 = vrot.slane %v4037_v17, 7 }
  0x7c   : > { %535 = vrot.lane.b32.xlu1 %v254_v14, %s3808_s18  ;;  %v4148_v14 = vshrl.u32 %v4124_v63, 16  ;;  %v4189_v40 = vor.u32 %v4039_v18, %v331_v25  ;;  %3190 = vmatpush3.bf16.msra.mxu0 %v736_v35  ;;  %v447_v42 = vor.u32 %v446_v11, %v4144_v10  ;;  %v448_v43 = vrot.slane %v4151_v15, 1  ;;  %p3739_p2 = pnand %p3738_p12, %p3732_p3 }
  0x7d   : > { %537 = vrot.lane.b32.xlu0 %v255_v21, %s3808_s18  ;;  %v502_v21 = vsel %vm4047_vm2, %v441_v3, %v4088_v46  ;;  %3522 = vmatprep.subr.msk.bf16.mxu0 %vm734_vm3, %v4153_v20  ;;  %v343_v13 = vrot.slane %v4071_v37, 7  ;;  %v4202_v18 = vpack.c.bf16 %v244_v31, %v243_v29  ;;  %v415_v45 = vsel %vm4175_vm6, %v4030_v12, %v4186_v39 }
  0x7e   : > { %v4213_v47 = vor.u32 %v4041_v19, %v339_v41  ;;  %v4216_v48 = vshll.u32 %v4158_v22, 16  ;;  %v347_v52 = vrot.slane %v4084_v44, 7  ;;  %v351_v55 = vrot.slane %v4102_v53, 7 }
  0x7f   : > { %v4219_v51 = vor.u32 %v4057_v30, %v343_v13  ;;  %v355_v56 = vrot.slane %v4109_v57, 7  ;;  %v359_v58 = vrot.slane %v4134_v5, 7  ;;  %v363_v30 = vrot.slane %v4144_v10, 7 }
  0x80   : > { %583 = vrot.lane.b32.xlu1 %v500_v61, %s3809_s20  ;;  %v416_v19 = vsel %vm4175_vm6, %v4037_v17, %v4213_v47  ;;  %v4237_v61 = vor.u32 %v4061_v33, %v347_v52  ;;  %v4240_v0 = vor.u32 %v4088_v46, %v351_v55  ;;  %v367_v1 = vrot.slane %v4148_v14, 7  ;;  %v250_v52 = vld [vmem:[%s4010_s30 + $0xf8] sm:$0xff] }
  0x81   : > { %585 = vrot.lane.b32.xlu0 %v501_v2, %s3809_s20  ;;  %v417_v59 = vsel %vm4175_vm6, %v4071_v37, %v4219_v51  ;;  %v4244_v2 = vor.u32 %v4092_v49, %v355_v56  ;;  %v4247_v3 = vor.u32 %v4114_v60, %v359_v58  ;;  %v4250_v4 = vor.u32 %v4122_v62, %v363_v30  ;;  %v248_v56 = vld [vmem:[%s4010_s30 + $0xe8] sm:$0xff] }
  0x82   : > { %v371_v6 = vrot.slane %v4169_v28, 7  ;;  %v418_v33 = vsel %vm4175_vm6, %v4084_v44, %v4237_v61  ;;  %v419_v46 = vsel %vm4175_vm6, %v4102_v53, %v4240_v0  ;;  %v4264_v49 = vor.u32 %v4151_v15, %v367_v1 }
  0x83   : > { %v421_v23 = vsel %vm4175_vm6, %v4134_v5, %v4247_v3  ;;  %v422_v25 = vsel %vm4175_vm6, %v4144_v10, %v4250_v4  ;;  %v4291_v29 = vshrl.u32 %v4202_v18, 16  ;;  %v450_v41 = vrot.slane %v4183_v38, 1 }
  0x84   : > { %539 = vrot.lane.b32.xlu1 %v4063_v34, %s3808_s18  ;;  %v4197_v34 = vshrl.u32 %v4158_v22, 16  ;;  %v264_v13 = vpack.c.bf16 %v246_v8, %v245_v7  ;;  %v449_v58 = vor.u32 %v448_v43, %v4148_v14  ;;  %vm658_vm8 = vcmask 64512  }
  0x85   : > { %541 = vrot.lane.b32.xlu0 %v4068_v36, %s3808_s18  ;;  %v414_v36 = vsel %vm4175_vm6, %v4035_v16, %v4189_v40  ;;  %v379_v55 = vrot.slane %v4291_v29, 7  ;;  %v451_v1 = vor.u32 %v450_v41, %v4169_v28  ;;  %v452_v41 = vrot.slane %v4216_v48, 1 }
  0x86   : > { %v375_v11 = vrot.slane %v4197_v34, 7  ;;  %v506_v43 = vsel %vm4047_vm2, %v449_v58, %v4151_v15  ;;  %vm701_vm9 = vcmask 97280   ;;  %v6025_v3 = vsel %vm4175_vm6, %v4148_v14, %v4264_v49 }
  0x87   : > { %v453_v58 = vor.u32 %v452_v41, %v4197_v34 }
  0x88   : > { %587 = vrot.lane.b32.xlu1 %v502_v21, %s3809_s20  ;;  %v420_v21 = vsel %vm4175_vm6, %v4109_v57, %v4244_v2  ;;  %v4298_v35 = vor.u32 %v4216_v48, %v375_v11  ;;  %v249_v11 = vld [vmem:[%s4010_s30 + $0xf0] sm:$0xff] }
  0x89   : > { %589 = vrot.lane.b32.xlu0 %v503_v26, %s3809_s20  ;;  %v4282_v26 = vor.u32 %v4183_v38, %v371_v6  ;;  %v384_v6 = vshll.u32 %v264_v13, 16  ;;  %v508_v41 = vsel %vm4047_vm2, %v453_v58, %v4216_v48 }
  0x8a   : > { %v6027_v49 = vsel %vm4175_vm6, %v4197_v34, %v4298_v35 }
  0x8c   : > { %543 = vrot.lane.b32.xlu1 %v4094_v50, %s3808_s18  ;;  %v504_v50 = vsel %vm4047_vm2, %v4166_v27, %v4114_v60  ;;  %v424_v60 = vsel %vm4175_vm6, %v4169_v28, %v4282_v26  ;;  %v380_v27 = vshll.u32 %v4202_v18, 16 }
  0x8d   : > { %545 = vrot.lane.b32.xlu0 %v4104_v54, %s3808_s18  ;;  %v505_v54 = vsel %vm4047_vm2, %v447_v42, %v4122_v62  ;;  %v4315_v62 = vshrl.u32 %v264_v13, 16  ;;  %v247_v42 = vld [vmem:[%s4010_s30 + $0xe0] sm:$0xff] }
  0x8e   : > { %v4321_v30 = vor.u32 %v380_v27, %v379_v55  ;;  %v265_v8 = vpack.c.bf16 %v248_v56, %v247_v42  ;;  %v507_v42 = vsel %vm4047_vm2, %v451_v1, %v4183_v38  ;;  %v454_v56 = vrot.slane %v380_v27, 1 }
  0x8f   : > { %v383_v7 = vrot.slane %v4315_v62, 7 }
  0x90   : > { %591 = vrot.lane.b32.xlu1 %v504_v50, %s3809_s20  ;;  %v4341_v55 = vshrl.u32 %v265_v8, 16  ;;  %v266_v50 = vpack.c.bf16 %v250_v52, %v249_v11  ;;  %v455_v38 = vor.u32 %v454_v56, %v4291_v29 }
  0x91   : > { %593 = vrot.lane.b32.xlu0 %v505_v54, %s3809_s20  ;;  %v4333_v54 = vor.u32 %v384_v6, %v383_v7 }
  0x92   : > { %v387_v7 = vrot.slane %v4341_v55, 7  ;;  %v4352_v15 = vshrl.u32 %v266_v50, 16  ;;  %v392_v52 = vshll.u32 %v266_v50, 16  ;;  %v509_v56 = vsel %vm4047_vm2, %v455_v38, %v380_v27 }
  0x93   : > { %v6028_v35 = vsel %vm4175_vm6, %v4315_v62, %v4333_v54 }
  0x94   : > { %547 = vrot.lane.b32.xlu1 %v4124_v63, %s3808_s18  ;;  %v391_v1 = vrot.slane %v4352_v15, 7  ;;  %v460_v27 = vrot.slane %v392_v52, 1 }
  0x95   : > { %549 = vrot.lane.b32.xlu0 %v4140_v9, %s3808_s18  ;;  %v388_v9 = vshll.u32 %v265_v8, 16 }
  0x96   : > { %v461_v38 = vor.u32 %v460_v27, %v4352_v15 }
  0x97   : > { %v4356_v31 = vor.u32 %v388_v9, %v387_v7  ;;  %v458_v7 = vrot.slane %v388_v9, 1 }
  0x98   : > { %595 = vrot.lane.b32.xlu1 %v506_v43, %s3809_s20  ;;  %v4366_v43 = vor.u32 %v392_v52, %v391_v1 }
  0x99   : > { %597 = vrot.lane.b32.xlu0 %v507_v42, %s3809_s20  ;;  %v428_v11 = vsel %vm4175_vm6, %v4341_v55, %v4356_v31  ;;  %v456_v42 = vrot.slane %v384_v6, 1 }
  0x9a   : > { %v429_v63 = vsel %vm4175_vm6, %v4352_v15, %v4366_v43 }
  0x9c   : > { %551 = vrot.lane.b32.xlu1 %v4158_v22, %s3808_s18  ;;  %v457_v22 = vor.u32 %v456_v42, %v4315_v62  ;;  %v4421_v42 = vld [vmem:[#allocation5 + $0x10] sm:$0x3f]  }
  0x9d   : > { %553 = vrot.lane.b32.xlu0 %v4202_v18, %s3808_s18  ;;  %v459_v18 = vor.u32 %v458_v7, %v4341_v55 }
  0x9e   : > { %v510_v48 = vsel %vm4047_vm2, %v457_v22, %v384_v6 }
  0x9f   : > { %v511_v58 = vsel %vm4047_vm2, %v459_v18, %v388_v9 }
  0xa0   : > { %599 = vrot.lane.b32.xlu1 %v508_v41, %s3809_s20 }
  0xa1   : > { %601 = vrot.lane.b32.xlu0 %v509_v56, %s3809_s20 }
  0xa4   : > { %555 = vrot.lane.b32.xlu1 %v264_v13, %s3808_s18  ;;  %v512_v13 = vsel %vm4047_vm2, %v461_v38, %v392_v52 }
  0xa5   : > { %557 = vrot.lane.b32.xlu0 %v265_v8, %s3808_s18 }
  0xa8   : > { %603 = vrot.lane.b32.xlu1 %v510_v48, %s3809_s20 }
  0xa9   : > { %605 = vrot.lane.b32.xlu0 %v511_v58, %s3809_s20 }
  0xac   : > { %559 = vrot.lane.b32.xlu1 %v266_v50, %s3808_s18 }
  0xb0   : > { %607 = vrot.lane.b32.xlu1 %v512_v13, %s3809_s20 }
  0xdf   : > { %v532_v8 = vpop.permute.xlu0 %531 }
  0xe0   : > { %v615_v9 = vsel %vm609_vm7, %v415_v45, %v532_v8  ;;  %v905_v45 = vsel %vm734_vm3, %v4153_v20, 0 }
  0xe3   : > { %v530_v6 = vpop.permute.xlu0 %529 }
  0xe4   : > { %v612_v52 = vsel %vm609_vm7, %v414_v36, %v530_v6 }
  0xe6   : > { %v580_v1 = vpop.permute.xlu1 %579 }
  0xe7   : > { %v4403_v50 = vsel %vm658_vm8, %v615_v9, %v580_v1  ;;  %v534_v41 = vpop.permute.xlu0 %533 }
  0xe8   : > { %3191 = vmatprep.mubr.msk.bf16.mxu0 %vm701_vm9, %v4403_v50  ;;  %v618_v12 = vsel %vm609_vm7, %v416_v19, %v534_v41 }
  0xea   : > { %v578_v39 = vpop.permute.xlu1 %577 }
  0xeb   : > { %v4424_v16 = vsel %vm658_vm8, %v612_v52, %v578_v39  ;;  %v582_v40 = vpop.permute.xlu0 %581 }
  0xec   : > { %3192 = vmatmul.mubr.msk.bf16.vlgmr.msra.gmra.mrb[0].mxu0 %vm701_vm9, %v4424_v16  ;;  %v4429_v36 = vsel %vm658_vm8, %v618_v12, %v582_v40 }
  0xed   : > { %3224 = vmatpush3.bf16.msra.mxu0 %v905_v45  ;;  %3195 = vmatprep.mubr.msk.bf16.mxu0 %vm701_vm9, %v4429_v36 }
  0xee   : > { %v536_v17 = vpop.permute.xlu1 %535  ;;  %3523 = vmatprep.subr.msk.bf16.mxu0 %vm734_vm3, %v4421_v42 }
  0xef   : > { %v538_v20 = vpop.permute.xlu0 %537  ;;  %v621_v19 = vsel %vm609_vm7, %v417_v59, %v536_v17 }
  0xf0   : > { %v624_v47 = vsel %vm609_vm7, %v418_v33, %v538_v20 }
  0xf2   : > { %v584_v56 = vpop.permute.xlu1 %583 }
  0xf3   : > { %v4448_v7 = vsel %vm658_vm8, %v621_v19, %v584_v56  ;;  %v586_v22 = vpop.permute.xlu0 %585 }
  0xf4   : > { %3196 = vmatmul.mubr.msk.bf16.gmra.mrb[4].mxu0 %vm701_vm9, %v4448_v7  ;;  %v4453_v18 = vsel %vm658_vm8, %v624_v47, %v586_v22 }
  0xf5   : > { %3199 = vmatprep.mubr.msk.bf16.mxu0 %vm701_vm9, %v4453_v18 }
  0xf6   : > { %v540_v44 = vpop.permute.xlu1 %539 }
  0xf7   : > { %v542_v61 = vpop.permute.xlu0 %541  ;;  %v627_v51 = vsel %vm609_vm7, %v419_v46, %v540_v44 }
  0xf8   : > { %v630_v37 = vsel %vm609_vm7, %v420_v21, %v542_v61 }
  0xfa   : > { %v588_v59 = vpop.permute.xlu1 %587 }
  0xfb   : > { %v4470_v33 = vsel %vm658_vm8, %v627_v51, %v588_v59  ;;  %v590_v48 = vpop.permute.xlu0 %589 }
  0xfc   : > { %3200 = vmatmul.mubr.msk.bf16.gmra.mrb[8].mxu0 %vm701_vm9, %v4470_v33  ;;  %v4475_v27 = vsel %vm658_vm8, %v630_v37, %v590_v48 }
  0xfd   : > { %3203 = vmatprep.mubr.msk.bf16.mxu0 %vm701_vm9, %v4475_v27 }
  0xfe   : > { %v544_v57 = vpop.permute.xlu1 %543 }
  0xff   : > { %v546_v2 = vpop.permute.xlu0 %545  ;;  %v633_v0 = vsel %vm609_vm7, %v421_v23, %v544_v57 }
 0x100   : > { %v636_v53 = vsel %vm609_vm7, %v422_v25, %v546_v2 }
 0x102   : > { %v592_v46 = vpop.permute.xlu1 %591 }
 0x103   : > { %v4492_v21 = vsel %vm658_vm8, %v633_v0, %v592_v46  ;;  %v594_v58 = vpop.permute.xlu0 %593 }
 0x104   : > { %3204 = vmatmul.mubr.msk.bf16.gmra.mrb[12].mxu0 %vm701_vm9, %v4492_v21  ;;  %v676_v38 = vsel %vm658_vm8, %v636_v53, %v594_v58 }
 0x105   : > { %3207 = vmatprep.mubr.msk.bf16.mxu0 %vm701_vm9, %v676_v38 }
 0x106   : > { %v548_v10 = vpop.permute.xlu1 %547 }
 0x107   : > { %v550_v4 = vpop.permute.xlu0 %549  ;;  %v639_v23 = vsel %vm609_vm7, %v6025_v3, %v548_v10 }
 0x108   : > { %v642_v5 = vsel %vm609_vm7, %v424_v60, %v550_v4  ;;  %v6026_v60 = vsel %vm4175_vm6, %v4291_v29, %v4321_v30 }
 0x10a   : > { %v596_v25 = vpop.permute.xlu1 %595 }
 0x10b   : > { %v678_v13 = vsel %vm658_vm8, %v639_v23, %v596_v25  ;;  %v598_v8 = vpop.permute.xlu0 %597 }
 0x10c   : > { %3208 = vmatmul.mubr.msk.bf16.gmra.mrb[16].mxu0 %vm701_vm9, %v678_v13  ;;  %v680_v6 = vsel %vm658_vm8, %v642_v5, %v598_v8 }
 0x10d   : > { %3211 = vmatprep.mubr.msk.bf16.mxu0 %vm701_vm9, %v680_v6 }
 0x10e   : > { %v552_v28 = vpop.permute.xlu1 %551 }
 0x10f   : > { %v554_v26 = vpop.permute.xlu0 %553  ;;  %v645_v9 = vsel %vm609_vm7, %v6027_v49, %v552_v28 }
 0x110   : > { %v648_v14 = vsel %vm609_vm7, %v6026_v60, %v554_v26 }
 0x112   : > { %v600_v1 = vpop.permute.xlu1 %599 }
 0x113   : > { %v682_v41 = vsel %vm658_vm8, %v645_v9, %v600_v1  ;;  %v602_v52 = vpop.permute.xlu0 %601 }
 0x114   : > { %3212 = vmatmul.mubr.msk.bf16.gmra.mrb[20].mxu0 %vm701_vm9, %v682_v41  ;;  %v684_v12 = vsel %vm658_vm8, %v648_v14, %v602_v52 }
 0x115   : > { %3215 = vmatprep.mubr.msk.bf16.mxu0 %vm701_vm9, %v684_v12 }
 0x116   : > { %v556_v29 = vpop.permute.xlu1 %555 }
 0x117   : > { %v558_v30 = vpop.permute.xlu0 %557  ;;  %v651_v39 = vsel %vm609_vm7, %v6028_v35, %v556_v29 }
 0x118   : > { %v654_v34 = vsel %vm609_vm7, %v428_v11, %v558_v30  ;;  %v1077_v11 = vsel %vm734_vm3, %v4421_v42, 0 }
 0x11a   : > { %v604_v45 = vpop.permute.xlu1 %603 }
 0x11b   : > { %v686_v40 = vsel %vm658_vm8, %v651_v39, %v604_v45  ;;  %v606_v17 = vpop.permute.xlu0 %605 }
 0x11c   : > { %3216 = vmatmul.mubr.msk.bf16.gmra.mrb[24].mxu0 %vm701_vm9, %v686_v40  ;;  %v688_v20 = vsel %vm658_vm8, %v654_v34, %v606_v17 }
 0x11d   : > { %3219 = vmatprep.mubr.msk.bf16.mxu0 %vm701_vm9, %v688_v20 }
 0x11e   : > { %v560_v31 = vpop.permute.xlu1 %559 }
 0x11f   : > { %v657_v62 = vsel %vm609_vm7, %v429_v63, %v560_v31 }
 0x122   : > { %v608_v54 = vpop.permute.xlu1 %607 }
 0x123   : > { %v690_v55 = vsel %vm658_vm8, %v657_v62, %v608_v54 }
 0x124   : > { %3220 = vmatmul.mubr.msk.bf16.gmra.mrb[28].mxu0 %vm701_vm9, %v690_v55 }
 0x125   : > { %3225 = vmatprep.mubr.msk.bf16.mxu0 %vm701_vm9, %v4424_v16 }
 0x12c   : > { %3226 = vmatmul.mubr.msk.bf16.vlgmr.msra.gmra.mrb[0].mxu0 %vm701_vm9, %v4403_v50 }
 0x12d   : > { %3258 = vmatpush3.bf16.msra.mxu0 %v1077_v11  ;;  %3229 = vmatprep.mubr.msk.bf16.mxu0 %vm701_vm9, %v4424_v16 }
 0x134   : > { %3230 = vmatmul.mubr.msk.bf16.gmra.mrb[4].mxu0 %vm701_vm9, %v4429_v36 }
 0x135   : > { %3233 = vmatprep.mubr.msk.bf16.mxu0 %vm701_vm9, %v4448_v7 }
 0x13c   : > { %3234 = vmatmul.mubr.msk.bf16.gmra.mrb[8].mxu0 %vm701_vm9, %v4453_v18 }
 0x13d   : > { %3237 = vmatprep.mubr.msk.bf16.mxu0 %vm701_vm9, %v4470_v33 }
 0x144   : > { %3238 = vmatmul.mubr.msk.bf16.gmra.mrb[12].mxu0 %vm701_vm9, %v4475_v27 }
 0x145   : > { %3241 = vmatprep.mubr.msk.bf16.mxu0 %vm701_vm9, %v4492_v21 }
 0x14c   : > { %3242 = vmatmul.mubr.msk.bf16.gmra.mrb[16].mxu0 %vm701_vm9, %v676_v38 }
 0x14d   : > { %3245 = vmatprep.mubr.msk.bf16.mxu0 %vm701_vm9, %v678_v13 }
 0x154   : > { %3246 = vmatmul.mubr.msk.bf16.gmra.mrb[20].mxu0 %vm701_vm9, %v680_v6 }
 0x155   : > { %3249 = vmatprep.mubr.msk.bf16.mxu0 %vm701_vm9, %v682_v41 }
 0x15c   : > { %3250 = vmatmul.mubr.msk.bf16.gmra.mrb[24].mxu0 %vm701_vm9, %v684_v12 }
 0x15d   : > { %3253 = vmatprep.mubr.msk.bf16.mxu0 %vm701_vm9, %v686_v40 }
 0x164   : > { %3254 = vmatmul.mubr.msk.bf16.gmra.mrb[28].mxu0 %vm701_vm9, %v688_v20 }
 0x165   : > { %3259 = vmatprep.mubr.msk.bf16.mxu0 %vm701_vm9, %v4424_v16 }
 0x16c   : > { %3260 = vmatmul.mubr.msk.bf16.vlgmr.msra.gmra.mrb[0].mxu0 %vm701_vm9, %v4429_v36 }
 0x16d   : > { %3263 = vmatprep.mubr.msk.bf16.mxu0 %vm701_vm9, %v4448_v7 }
 0x174   : > { %3264 = vmatmul.mubr.msk.bf16.gmra.mrb[4].mxu0 %vm701_vm9, %v4453_v18 }
 0x175   : > { %3267 = vmatprep.mubr.msk.bf16.mxu0 %vm701_vm9, %v4470_v33 }
 0x17c   : > { %3268 = vmatmul.mubr.msk.bf16.gmra.mrb[8].mxu0 %vm701_vm9, %v4475_v27 }
 0x17d   : > { %3271 = vmatprep.mubr.msk.bf16.mxu0 %vm701_vm9, %v4492_v21 }
 0x184   : > { %3272 = vmatmul.mubr.msk.bf16.gmra.mrb[12].mxu0 %vm701_vm9, %v676_v38 }
 0x185   : > { %3275 = vmatprep.mubr.msk.bf16.mxu0 %vm701_vm9, %v678_v13 }
 0x18c   : > { %3276 = vmatmul.mubr.msk.bf16.gmra.mrb[16].mxu0 %vm701_vm9, %v680_v6 }
 0x18d   : > { %3279 = vmatprep.mubr.msk.bf16.mxu0 %vm701_vm9, %v682_v41 }
 0x194   : > { %3280 = vmatmul.mubr.msk.bf16.gmra.mrb[20].mxu0 %vm701_vm9, %v684_v12 }
 0x195   : > { %3283 = vmatprep.mubr.msk.bf16.mxu0 %vm701_vm9, %v686_v40 }
 0x19c   : > { %3284 = vmatmul.mubr.msk.bf16.gmra.mrb[24].mxu0 %vm701_vm9, %v688_v20 }
 0x19d   : > { %3287 = vmatprep.mubr.msk.bf16.mxu0 %vm701_vm9, %v690_v55 }
 0x1a4   : > { %3288 = vmatmul.mubr.msk.bf16.gmra.mrb[28].mxu0 %vm701_vm9, %v688_v20 }
 0x23f   : > { %v4604_v63 = vpop.f32.mrb[0].mxu0 }
 0x240   : > { %v4606_v15 = vpop.f32.mrb[1].mxu0  ;;  %v1343_v16 = vmul.f32 %v4604_v63, %v4604_v63  ;;  %v1275_v7 = vsel %vm609_vm7, %v4604_v63, 0.0 }
 0x241   : > { %v1341_v43 = vmul.f32 %v4606_v15, %v4606_v15  ;;  %v4610_v50 = vpop.f32.mrb[2].mxu0  ;;  %v1272_v36 = vsel %vm609_vm7, %v4606_v15, 0.0 }
 0x242   : > { %v4612_v42 = vpop.f32.mrb[3].mxu0  ;;  %v1344_v18 = vmul.f32 %v4610_v50, %v4610_v50  ;;  %v1376_v51 = vsel %vm609_vm7, %v1343_v16, 0.0  ;;  %v1277_v59 = vsel %vm609_vm7, %v4610_v50, 0.0 }
 0x243   : > { %v1273_v47 = vsel %vm609_vm7, %v4612_v42, 0.0  ;;  %v1342_v19 = vmul.f32 %v4612_v42, %v4612_v42  ;;  %v1373_v22 = vsel %vm609_vm7, %v1341_v43, 0.0 }
 0x244   : > { %v1274_v56 = vadd.f32 %v1273_v47, %v1272_v36  ;;  %v1378_v2 = vsel %vm609_vm7, %v1344_v18, 0.0 }
 0x245   : > { %v1374_v44 = vsel %vm609_vm7, %v1342_v19, 0.0 }
 0x246   : > { %v1276_v61 = vadd.f32 %v1275_v7, %v1274_v56  ;;  %v1375_v37 = vadd.f32 %v1374_v44, %v1373_v22 }
 0x247   : > { %v4631_v33 = vpop.f32.mrb[4].mxu0 }
 0x248   : > { %v1377_v48 = vadd.f32 %v1376_v51, %v1375_v37  ;;  %v4633_v27 = vpop.f32.mrb[5].mxu0  ;;  %v1278_v57 = vadd.f32 %v1277_v59, %v1276_v61  ;;  %v1347_v10 = vmul.f32 %v4631_v33, %v4631_v33  ;;  %v1283_v13 = vsel %vm609_vm7, %v4631_v33, 0.0 }
 0x249   : > { %v1279_v53 = vsel %vm609_vm7, %v4633_v27, 0.0  ;;  %v1345_v0 = vmul.f32 %v4633_v27, %v4633_v27  ;;  %v4640_v46 = vpop.f32.mrb[6].mxu0 }
 0x24a   : > { %v1280_v21 = vadd.f32 %v1279_v53, %v1278_v57  ;;  %v1379_v58 = vadd.f32 %v1378_v2, %v1377_v48  ;;  %v4642_v38 = vpop.f32.mrb[7].mxu0  ;;  %v1348_v8 = vmul.f32 %v4640_v46, %v4640_v46  ;;  %v1384_v60 = vsel %vm609_vm7, %v1347_v10, 0.0 }
 0x24b   : > { %v1380_v4 = vsel %vm609_vm7, %v1345_v0, 0.0  ;;  %v1281_v5 = vsel %vm609_vm7, %v4642_v38, 0.0  ;;  %v1346_v3 = vmul.f32 %v4642_v38, %v4642_v38  ;;  %v1285_v14 = vsel %vm609_vm7, %v4640_v46, 0.0 }
 0x24c   : > { %v1381_v23 = vadd.f32 %v1380_v4, %v1379_v58  ;;  %v1282_v25 = vadd.f32 %v1281_v5, %v1280_v21  ;;  %v1386_v52 = vsel %vm609_vm7, %v1348_v8, 0.0 }
 0x24d   : > { %v1382_v6 = vsel %vm609_vm7, %v1346_v3, 0.0 }
 0x24e   : > { %v1284_v28 = vadd.f32 %v1283_v13, %v1282_v25  ;;  %v1383_v26 = vadd.f32 %v1382_v6, %v1381_v23 }
 0x24f   : > { %v4659_v49 = vpop.f32.mrb[8].mxu0 }
 0x250   : > { %v1385_v9 = vadd.f32 %v1384_v60, %v1383_v26  ;;  %v4661_v1 = vpop.f32.mrb[9].mxu0  ;;  %v1286_v41 = vadd.f32 %v1285_v14, %v1284_v28  ;;  %v1351_v45 = vmul.f32 %v4659_v49, %v4659_v49  ;;  %v1291_v54 = vsel %vm609_vm7, %v4659_v49, 0.0 }
 0x251   : > { %v1287_v12 = vsel %vm609_vm7, %v4661_v1, 0.0  ;;  %v1349_v29 = vmul.f32 %v4661_v1, %v4661_v1  ;;  %v4668_v30 = vpop.f32.mrb[10].mxu0 }
 0x252   : > { %v1288_v34 = vadd.f32 %v1287_v12, %v1286_v41  ;;  %v1387_v35 = vadd.f32 %v1386_v52, %v1385_v9  ;;  %v4670_v39 = vpop.f32.mrb[11].mxu0  ;;  %v1352_v55 = vmul.f32 %v4668_v30, %v4668_v30  ;;  %v1392_v36 = vsel %vm609_vm7, %v1351_v45, 0.0 }
 0x253   : > { %v1388_v40 = vsel %vm609_vm7, %v1349_v29, 0.0  ;;  %v1289_v17 = vsel %vm609_vm7, %v4670_v39, 0.0  ;;  %v1350_v20 = vmul.f32 %v4670_v39, %v4670_v39  ;;  %v1293_v47 = vsel %vm609_vm7, %v4668_v30, 0.0 }
 0x254   : > { %v1389_v31 = vadd.f32 %v1388_v40, %v1387_v35  ;;  %v1290_v62 = vadd.f32 %v1289_v17, %v1288_v34  ;;  %v1394_v18 = vsel %vm609_vm7, %v1352_v55, 0.0 }
 0x255   : > { %v1390_v11 = vsel %vm609_vm7, %v1350_v20, 0.0 }
 0x256   : > { %v1292_v43 = vadd.f32 %v1291_v54, %v1290_v62  ;;  %v1391_v16 = vadd.f32 %v1390_v11, %v1389_v31 }
 0x257   : > { %v4687_v19 = vpop.f32.mrb[12].mxu0 }
 0x258   : > { %v1393_v56 = vadd.f32 %v1392_v36, %v1391_v16  ;;  %v4689_v7 = vpop.f32.mrb[13].mxu0  ;;  %v1294_v22 = vadd.f32 %v1293_v47, %v1292_v43  ;;  %v1355_v57 = vmul.f32 %v4687_v19, %v4687_v19  ;;  %v1299_v10 = vsel %vm609_vm7, %v4687_v19, 0.0 }
 0x259   : > { %v1295_v44 = vsel %vm609_vm7, %v4689_v7, 0.0  ;;  %v1353_v61 = vmul.f32 %v4689_v7, %v4689_v7  ;;  %v4696_v37 = vpop.f32.mrb[14].mxu0 }
 0x25a   : > { %v1296_v51 = vadd.f32 %v1295_v44, %v1294_v22  ;;  %v1395_v59 = vadd.f32 %v1394_v18, %v1393_v56  ;;  %v4698_v48 = vpop.f32.mrb[15].mxu0  ;;  %v1356_v4 = vmul.f32 %v4696_v37, %v4696_v37  ;;  %v1400_v25 = vsel %vm609_vm7, %v1355_v57, 0.0 }
 0x25b   : > { %v1396_v2 = vsel %vm609_vm7, %v1353_v61, 0.0  ;;  %v1297_v53 = vsel %vm609_vm7, %v4698_v48, 0.0  ;;  %v1354_v0 = vmul.f32 %v4698_v48, %v4698_v48  ;;  %v1301_v13 = vsel %vm609_vm7, %v4696_v37, 0.0 }
 0x25c   : > { %v1397_v21 = vadd.f32 %v1396_v2, %v1395_v59  ;;  %v1298_v58 = vadd.f32 %v1297_v53, %v1296_v51  ;;  %v1402_v60 = vsel %vm609_vm7, %v1356_v4, 0.0 }
 0x25d   : > { %v1398_v5 = vsel %vm609_vm7, %v1354_v0, 0.0 }
 0x25e   : > { %v1300_v3 = vadd.f32 %v1299_v10, %v1298_v58  ;;  %v1399_v23 = vadd.f32 %v1398_v5, %v1397_v21 }
 0x25f   : > { %v4715_v8 = vpop.f32.mrb[16].mxu0 }
 0x260   : > { %v1401_v6 = vadd.f32 %v1400_v25, %v1399_v23  ;;  %v4717_v28 = vpop.f32.mrb[17].mxu0  ;;  %v1302_v26 = vadd.f32 %v1301_v13, %v1300_v3  ;;  %v1359_v34 = vmul.f32 %v4715_v8, %v4715_v8  ;;  %v1307_v31 = vsel %vm609_vm7, %v4715_v8, 0.0 }
 0x261   : > { %v1303_v14 = vsel %vm609_vm7, %v4717_v28, 0.0  ;;  %v1357_v9 = vmul.f32 %v4717_v28, %v4717_v28  ;;  %v4724_v41 = vpop.f32.mrb[18].mxu0 }
 0x262   : > { %v1304_v52 = vadd.f32 %v1303_v14, %v1302_v26  ;;  %v1403_v12 = vadd.f32 %v1402_v60, %v1401_v6  ;;  %v4726_v29 = vpop.f32.mrb[19].mxu0  ;;  %v1360_v62 = vmul.f32 %v4724_v41, %v4724_v41  ;;  %v1408_v43 = vsel %vm609_vm7, %v1359_v34, 0.0 }
 0x263   : > { %v1404_v35 = vsel %vm609_vm7, %v1357_v9, 0.0  ;;  %v1305_v45 = vsel %vm609_vm7, %v4726_v29, 0.0  ;;  %v1358_v40 = vmul.f32 %v4726_v29, %v4726_v29  ;;  %v1309_v16 = vsel %vm609_vm7, %v4724_v41, 0.0 }
 0x264   : > { %v1405_v17 = vadd.f32 %v1404_v35, %v1403_v12  ;;  %v1306_v20 = vadd.f32 %v1305_v45, %v1304_v52  ;;  %v1410_v18 = vsel %vm609_vm7, %v1360_v62, 0.0 }
 0x265   : > { %v1406_v54 = vsel %vm609_vm7, %v1358_v40, 0.0 }
 0x266   : > { %v1308_v55 = vadd.f32 %v1307_v31, %v1306_v20  ;;  %v1407_v11 = vadd.f32 %v1406_v54, %v1405_v17 }
 0x267   : > { %v4743_v36 = vpop.f32.mrb[20].mxu0 }
 0x268   : > { %v1409_v47 = vadd.f32 %v1408_v43, %v1407_v11  ;;  %v4745_v56 = vpop.f32.mrb[21].mxu0  ;;  %v1310_v22 = vadd.f32 %v1309_v16, %v1308_v55  ;;  %v1363_v53 = vmul.f32 %v4743_v36, %v4743_v36  ;;  %v1315_v5 = vsel %vm609_vm7, %v4743_v36, 0.0 }
 0x269   : > { %v1311_v44 = vsel %vm609_vm7, %v4745_v56, 0.0  ;;  %v1361_v61 = vmul.f32 %v4745_v56, %v4745_v56  ;;  %v4752_v51 = vpop.f32.mrb[22].mxu0 }
 0x26a   : > { %v1312_v59 = vadd.f32 %v1311_v44, %v1310_v22  ;;  %v1411_v57 = vadd.f32 %v1410_v18, %v1409_v47  ;;  %v4754_v2 = vpop.f32.mrb[23].mxu0  ;;  %v1364_v3 = vmul.f32 %v4752_v51, %v4752_v51  ;;  %v1416_v6 = vsel %vm609_vm7, %v1363_v53, 0.0 }
 0x26b   : > { %v1412_v0 = vsel %vm609_vm7, %v1361_v61, 0.0  ;;  %v1313_v21 = vsel %vm609_vm7, %v4754_v2, 0.0  ;;  %v1362_v58 = vmul.f32 %v4754_v2, %v4754_v2  ;;  %v1317_v26 = vsel %vm609_vm7, %v4752_v51, 0.0 }
 0x26c   : > { %v1413_v10 = vadd.f32 %v1412_v0, %v1411_v57  ;;  %v1314_v4 = vadd.f32 %v1313_v21, %v1312_v59  ;;  %v1418_v12 = vsel %vm609_vm7, %v1364_v3, 0.0 }
 0x26d   : > { %v1414_v23 = vsel %vm609_vm7, %v1362_v58, 0.0 }
 0x26e   : > { %v1316_v25 = vadd.f32 %v1315_v5, %v1314_v4  ;;  %v1415_v13 = vadd.f32 %v1414_v23, %v1413_v10 }
 0x26f   : > { %v4771_v60 = vpop.f32.mrb[24].mxu0 }
 0x270   : > { %v1417_v14 = vadd.f32 %v1416_v6, %v1415_v13  ;;  %v4773_v9 = vpop.f32.mrb[25].mxu0  ;;  %v1318_v52 = vadd.f32 %v1317_v26, %v1316_v25  ;;  %v1367_v31 = vmul.f32 %v4771_v60, %v4771_v60  ;;  %v1323_v16 = vsel %vm609_vm7, %v4771_v60, 0.0 }
 0x271   : > { %v1319_v34 = vsel %vm609_vm7, %v4773_v9, 0.0  ;;  %v1365_v35 = vmul.f32 %v4773_v9, %v4773_v9  ;;  %v4780_v45 = vpop.f32.mrb[26].mxu0 }
 0x272   : > { %v1320_v40 = vadd.f32 %v1319_v34, %v1318_v52  ;;  %v1419_v17 = vadd.f32 %v1418_v12, %v1417_v14  ;;  %v4782_v20 = vpop.f32.mrb[27].mxu0  ;;  %v1368_v47 = vmul.f32 %v4780_v45, %v4780_v45  ;;  %v1424_v61 = vsel %vm609_vm7, %v1367_v31, 0.0 }
 0x273   : > { %v1420_v62 = vsel %vm609_vm7, %v1365_v35, 0.0  ;;  %v1321_v54 = vsel %vm609_vm7, %v4782_v20, 0.0  ;;  %v1366_v55 = vmul.f32 %v4782_v20, %v4782_v20  ;;  %v1325_v59 = vsel %vm609_vm7, %v4780_v45, 0.0 }
 0x274   : > { %v1421_v11 = vadd.f32 %v1420_v62, %v1419_v17  ;;  %v1322_v43 = vadd.f32 %v1321_v54, %v1320_v40  ;;  %v1426_v58 = vsel %vm609_vm7, %v1368_v47, 0.0 }
 0x275   : > { %v1422_v22 = vsel %vm609_vm7, %v1366_v55, 0.0 }
 0x276   : > { %v1324_v18 = vadd.f32 %v1323_v16, %v1322_v43  ;;  %v1423_v44 = vadd.f32 %v1422_v22, %v1421_v11 }
 0x277   : > { %v4799_v57 = vpop.f32.mrb[28].mxu0 }
 0x278   : > { %v1425_v53 = vadd.f32 %v1424_v61, %v1423_v44  ;;  %v4801_v0 = vpop.f32.mrb[29].mxu0  ;;  %v1326_v21 = vadd.f32 %v1325_v59, %v1324_v18  ;;  %v1371_v13 = vmul.f32 %v4799_v57, %v4799_v57  ;;  %v1331_v34 = vsel %vm609_vm7, %v4799_v57, 0.0 }
 0x279   : > { %v1327_v10 = vsel %vm609_vm7, %v4801_v0, 0.0  ;;  %v1369_v4 = vmul.f32 %v4801_v0, %v4801_v0  ;;  %v4808_v5 = vpop.f32.mrb[30].mxu0 }
 0x27a   : > { %v1328_v3 = vadd.f32 %v1327_v10, %v1326_v21  ;;  %v1427_v23 = vadd.f32 %v1426_v58, %v1425_v53  ;;  %v4810_v25 = vpop.f32.mrb[31].mxu0  ;;  %v1372_v35 = vmul.f32 %v4808_v5, %v4808_v5  ;;  %v1432_v62 = vsel %vm609_vm7, %v1371_v13, 0.0 }
 0x27b   : > { %v1428_v6 = vsel %vm609_vm7, %v1369_v4, 0.0  ;;  %v1329_v26 = vsel %vm609_vm7, %v4810_v25, 0.0  ;;  %v1370_v14 = vmul.f32 %v4810_v25, %v4810_v25  ;;  %v1333_v54 = vsel %vm609_vm7, %v4808_v5, 0.0 }
 0x27c   : > { %v1429_v52 = vadd.f32 %v1428_v6, %v1427_v23  ;;  %v1330_v12 = vadd.f32 %v1329_v26, %v1328_v3  ;;  %v1434_v43 = vsel %vm609_vm7, %v1372_v35, 0.0 }
 0x27d   : > { %v1430_v40 = vsel %vm609_vm7, %v1370_v14, 0.0 }
 0x27e   : > { %v1332_v17 = vadd.f32 %v1331_v34, %v1330_v12  ;;  %v1431_v31 = vadd.f32 %v1430_v40, %v1429_v52 }
 0x280   : > { %v1334_v55 = vadd.f32 %v1333_v54, %v1332_v17  ;;  %v1433_v11 = vadd.f32 %v1432_v62, %v1431_v31 }
 0x282   : > { %v1335_v16 = vrot.slane %v1334_v55, 4  ;;  %v1435_v47 = vadd.f32 %v1434_v43, %v1433_v11  ;;  %v4898_v11 = vld [vmem:[#allocation7 + $0x8] sm:$0x3f]  }
 0x283   : > { %3524 = vmatprep.subr.msk.bf16.mxu1 %vm734_vm3, %v4898_v11 }
 0x284   : > { %v1336_v22 = vadd.f32 %v1335_v16, %v1334_v55  ;;  %v1436_v18 = vrot.slane %v1435_v47, 4 }
 0x286   : > { %v1337_v44 = vrot.slane %v1336_v22, 2  ;;  %v1437_v61 = vadd.f32 %v1436_v18, %v1435_v47 }
 0x288   : > { %v1338_v59 = vadd.f32 %v1337_v44, %v1336_v22  ;;  %v1438_v53 = vrot.slane %v1437_v61, 2 }
 0x28a   : > { %v1339_v21 = vrot.slane %v1338_v59, 1  ;;  %v1439_v58 = vadd.f32 %v1438_v53, %v1437_v61 }
 0x28c   : > { %v1340_v10 = vadd.f32 %v1339_v21, %v1338_v59  ;;  %v1440_v4 = vrot.slane %v1439_v58, 1 }
 0x28e   : > { %v1441_v3 = vadd.f32 %v1440_v4, %v1439_v58  ;;  %v4828_v23 = vmul.f32 0.00390625, %v1340_v10 }
 0x290   : > { %v1443_v13 = vmul.f32 0.00390625, %v1441_v3  ;;  %v1444_v6 = vmul.f32 %v4828_v23, %v4828_v23  ;;  %v1477_v26 = vsub.f32 %v4810_v25, %v4828_v23  ;;  %v1448_v14 = vsub.f32 %v4606_v15, %v4828_v23 }
 0x291   : > { %v1449_v52 = vsub.f32 %v4612_v42, %v4828_v23  ;;  %v1450_v12 = vsub.f32 %v4604_v63, %v4828_v23  ;;  %v1451_v34 = vsub.f32 %v4610_v50, %v4828_v23  ;;  %v1452_v35 = vsub.f32 %v4633_v27, %v4828_v23 }
 0x292   : > { %v1445_v40 = vsub.f32 %v1443_v13, %v1444_v6  ;;  %v1453_v17 = vsub.f32 %v4642_v38, %v4828_v23  ;;  %v1454_v25 = vsub.f32 %v4631_v33, %v4828_v23  ;;  %v1455_v15 = vsub.f32 %v4640_v46, %v4828_v23 }
 0x293   : > { %v1456_v42 = vsub.f32 %v4661_v1, %v4828_v23  ;;  %v1457_v63 = vsub.f32 %v4670_v39, %v4828_v23  ;;  %v1458_v50 = vsub.f32 %v4659_v49, %v4828_v23  ;;  %v1459_v27 = vsub.f32 %v4668_v30, %v4828_v23 }
 0x294   : > { %v1446_v31 = vadd.f32 1e-05, %v1445_v40  ;;  %v1460_v38 = vsub.f32 %v4689_v7, %v4828_v23  ;;  %v1461_v33 = vsub.f32 %v4698_v48, %v4828_v23  ;;  %v1462_v46 = vsub.f32 %v4687_v19, %v4828_v23 }
 0x295   : > { %v1463_v1 = vsub.f32 %v4696_v37, %v4828_v23  ;;  %v1464_v39 = vsub.f32 %v4717_v28, %v4828_v23  ;;  %v1465_v49 = vsub.f32 %v4726_v29, %v4828_v23  ;;  %v1466_v30 = vsub.f32 %v4715_v8, %v4828_v23 }
 0x296   : > { %3607 = vrsqrt.f32 %v1446_v31  ;;  %v1467_v7 = vsub.f32 %v4724_v41, %v4828_v23  ;;  %v1468_v48 = vsub.f32 %v4745_v56, %v4828_v23  ;;  %v1469_v19 = vsub.f32 %v4754_v2, %v4828_v23 }
 0x297   : > { %v1470_v37 = vsub.f32 %v4743_v36, %v4828_v23  ;;  %v1471_v28 = vsub.f32 %v4752_v51, %v4828_v23  ;;  %v1472_v29 = vsub.f32 %v4773_v9, %v4828_v23  ;;  %v1473_v8 = vsub.f32 %v4782_v20, %v4828_v23 }
 0x298   : > { %v1474_v41 = vsub.f32 %v4771_v60, %v4828_v23  ;;  %v1475_v56 = vsub.f32 %v4780_v45, %v4828_v23  ;;  %v1476_v2 = vsub.f32 %v4801_v0, %v4828_v23  ;;  %v1478_v36 = vsub.f32 %v4799_v57, %v4828_v23 }
 0x299   : > { %v1479_v51 = vsub.f32 %v4808_v5, %v4828_v23 }
 0x2a0   : > { %v3608_v62 = vpop.eup %3607 }
 0x2a1   : > { %v4896_v9 = vmul.f32 %v3608_v62, %v1477_v26  ;;  %v1482_v54 = vmul.f32 %v3608_v62, %v1450_v12  ;;  %v1483_v20 = vmul.f32 %v3608_v62, %v1451_v34  ;;  %v1480_v55 = vmul.f32 %v3608_v62, %v1448_v14 }
 0x2a2   : > { %v1481_v60 = vmul.f32 %v3608_v62, %v1449_v52  ;;  %v1484_v43 = vmul.f32 %v3608_v62, %v1452_v35  ;;  %v1485_v45 = vmul.f32 %v3608_v62, %v1453_v17  ;;  %v1486_v16 = vmul.f32 %v3608_v62, %v1454_v25 }
 0x2a3   : > { %v1514_v47 = vmax.f32 %v1482_v54, 0.0  ;;  %v1515_v0 = vmax.f32 %v1483_v20, 0.0  ;;  %v1487_v22 = vmul.f32 %v3608_v62, %v1455_v15  ;;  %v1488_v57 = vmul.f32 %v3608_v62, %v1456_v42 }
 0x2a4   : > { %v1489_v5 = vmul.f32 %v3608_v62, %v1457_v63  ;;  %v1490_v18 = vmul.f32 %v3608_v62, %v1458_v50  ;;  %v1491_v44 = vmul.f32 %v3608_v62, %v1459_v27  ;;  %v4902_v59 = vmul.f32 %v3608_v62, %v1460_v38 }
 0x2a5   : > { %v1545_v61 = vpack.c.bf16 %v1515_v0, %v1514_v47  ;;  %v4904_v53 = vmul.f32 %v3608_v62, %v1461_v33  ;;  %v1494_v21 = vmul.f32 %v3608_v62, %v1462_v46  ;;  %v1495_v58 = vmul.f32 %v3608_v62, %v1463_v1 }
 0x2a6   : > { %v4906_v10 = vmul.f32 %v3608_v62, %v1464_v39  ;;  %v4908_v4 = vmul.f32 %v3608_v62, %v1465_v49  ;;  %v4910_v3 = vmul.f32 %v3608_v62, %v1466_v30  ;;  %v4915_v13 = vmul.f32 %v3608_v62, %v1467_v7 }
 0x2a7   : > { %1816 = vrot.lane.b32.xlu1 %v1545_v61, %s3808_s18  ;;  %v4913_v23 = vshrl.u32 %v1545_v61, 16  ;;  %v4917_v6 = vmul.f32 %v3608_v62, %v1468_v48  ;;  %v4919_v26 = vmul.f32 %v3608_v62, %v1469_v19  ;;  %v4921_v14 = vmul.f32 %v3608_v62, %v1470_v37 }
 0x2a8   : > { %v4923_v52 = vmul.f32 %v3608_v62, %v1471_v28  ;;  %v4925_v12 = vmul.f32 %v3608_v62, %v1472_v29  ;;  %v4927_v34 = vmul.f32 %v3608_v62, %v1473_v8  ;;  %v4929_v35 = vmul.f32 %v3608_v62, %v1474_v41 }
 0x2a9   : > { %v4931_v40 = vmul.f32 %v3608_v62, %v1475_v56  ;;  %v4933_v17 = vmul.f32 %v3608_v62, %v1476_v2  ;;  %v4935_v25 = vmul.f32 %v3608_v62, %v1478_v36  ;;  %v4937_v15 = vmul.f32 %v3608_v62, %v1479_v51 }
 0x2aa   : > { %v1512_v42 = vmax.f32 %v1480_v55, 0.0  ;;  %v1513_v63 = vmax.f32 %v1481_v60, 0.0  ;;  %v4939_v50 = vshll.u32 %v1545_v61, 16  ;;  %v1518_v27 = vmax.f32 %v1486_v16, 0.0 }
 0x2ab   : > { %v1519_v31 = vmax.f32 %v1487_v22, 0.0  ;;  %v1516_v38 = vmax.f32 %v1484_v43, 0.0  ;;  %v1517_v33 = vmax.f32 %v1485_v45, 0.0  ;;  %v1522_v39 = vmax.f32 %v1490_v18, 0.0 }
 0x2ac   : > { %v1544_v46 = vpack.c.bf16 %v1513_v63, %v1512_v42  ;;  %v1720_v1 = vrot.slane %v4939_v50, 1  ;;  %v1523_v49 = vmax.f32 %v1491_v44, 0.0  ;;  %v1520_v48 = vmax.f32 %v1488_v57, 0.0 }
 0x2ad   : > { %v1547_v30 = vpack.c.bf16 %v1519_v31, %v1518_v27  ;;  %v1546_v7 = vpack.c.bf16 %v1517_v33, %v1516_v38  ;;  %v1521_v19 = vmax.f32 %v1489_v5, 0.0  ;;  %v1526_v54 = vmax.f32 %v1494_v21, 0.0 }
 0x2ae   : > { %1818 = vrot.lane.b32.xlu0 %v1544_v46, %s3808_s18  ;;  %v1721_v37 = vor.u32 %v1720_v1, %v4913_v23  ;;  %v4944_v28 = vshll.u32 %v1544_v46, 16  ;;  %v1549_v29 = vpack.c.bf16 %v1523_v49, %v1522_v39  ;;  %v4950_v56 = vshrl.u32 %v1544_v46, 16 }
 0x2af   : > { %v4946_v8 = vshll.u32 %v1547_v30, 16  ;;  %v4948_v41 = vshll.u32 %v1546_v7, 16  ;;  %v1548_v51 = vpack.c.bf16 %v1521_v19, %v1520_v48  ;;  %v4959_v55 = vshrl.u32 %v1547_v30, 16 }
 0x2b0   : > { %v1784_v2 = vsel %vm4047_vm2, %v1721_v37, %v4939_v50  ;;  %v1722_v36 = vrot.slane %v4944_v28, 1  ;;  %v1527_v60 = vmax.f32 %v1495_v58, 0.0  ;;  %v4962_v45 = vshll.u32 %v1549_v29, 16 }
 0x2b1   : > { %1864 = vrot.lane.b32.xlu1 %v1784_v2, %s3809_s20  ;;  %v1726_v62 = vrot.slane %v4946_v8, 1  ;;  %v1724_v43 = vrot.slane %v4948_v41, 1  ;;  %v1524_v16 = vmax.f32 %v4902_v59, 0.0  ;;  %v1525_v57 = vmax.f32 %v4904_v53, 0.0 }
 0x2b2   : > { %v1723_v20 = vor.u32 %v1722_v36, %v4950_v56  ;;  %v4969_v22 = vpack.c.bf16 %v1527_v60, %v1526_v54  ;;  %v1530_v5 = vmax.f32 %v4910_v3, 0.0  ;;  %v4975_v18 = vshrl.u32 %v1546_v7, 16 }
 0x2b3   : > { %v1727_v0 = vor.u32 %v1726_v62, %v4959_v55  ;;  %v4977_v44 = vshll.u32 %v1548_v51, 16  ;;  %v4979_v61 = vpack.c.bf16 %v1525_v57, %v1524_v16  ;;  %v1730_v59 = vrot.slane %v4962_v45, 1 }
 0x2b4   : > { %v1785_v47 = vsel %vm4047_vm2, %v1723_v20, %v4944_v28  ;;  %v1531_v21 = vmax.f32 %v4915_v13, 0.0  ;;  %v1528_v58 = vmax.f32 %v4906_v10, 0.0  ;;  %v1529_v53 = vmax.f32 %v4908_v4, 0.0 }
 0x2b5   : > { %1866 = vrot.lane.b32.xlu0 %v1785_v47, %s3809_s20  ;;  %1822 = vrot.lane.b32.xlu1 %v1547_v30, %s3808_s18  ;;  %v1787_v42 = vsel %vm4047_vm2, %v1727_v0, %v4946_v8  ;;  %v1725_v3 = vor.u32 %v1724_v43, %v4975_v18  ;;  %v4989_v63 = vshrl.u32 %v1549_v29, 16  ;;  %v4992_v27 = vshll.u32 %v4969_v22, 16 }
 0x2b6   : > { %v4996_v13 = vpack.c.bf16 %v1531_v21, %v1530_v5  ;;  %v4998_v10 = vpack.c.bf16 %v1529_v53, %v1528_v58  ;;  %v1534_v4 = vmax.f32 %v4921_v14, 0.0  ;;  %v1535_v31 = vmax.f32 %v4923_v52, 0.0  ;;  %v5070_v53 = vld [vmem:[#allocation7] sm:$0x3f]  }
 0x2b7   : > { %v1728_v38 = vrot.slane %v4977_v44, 1  ;;  %v5004_v33 = vshll.u32 %v4979_v61, 16  ;;  %v1532_v46 = vmax.f32 %v4917_v6, 0.0  ;;  %v1533_v1 = vmax.f32 %v4919_v26, 0.0 }
 0x2b8   : > { %v5008_v39 = vshrl.u32 %v1548_v51, 16  ;;  %v1731_v49 = vor.u32 %v1730_v59, %v4989_v63  ;;  %v5012_v30 = vshll.u32 %v4996_v13, 16  ;;  %v1786_v14 = vsel %vm4047_vm2, %v1725_v3, %v4948_v41 }
 0x2b9   : > { %1820 = vrot.lane.b32.xlu0 %v1546_v7, %s3808_s18  ;;  %1870 = vrot.lane.b32.xlu1 %v1787_v42, %s3809_s20  ;;  %v5018_v52 = vshll.u32 %v4998_v10, 16  ;;  %v5020_v7 = vpack.c.bf16 %v1535_v31, %v1534_v4  ;;  %v5022_v48 = vpack.c.bf16 %v1533_v1, %v1532_v46  ;;  %v1734_v6 = vrot.slane %v4992_v27, 1 }
 0x2ba   : > { %v1538_v26 = vmax.f32 %v4929_v35, 0.0  ;;  %v1539_v19 = vmax.f32 %v4931_v40, 0.0  ;;  %v1541_v37 = vmax.f32 %v4896_v9, 0.0  ;;  %v1729_v2 = vor.u32 %v1728_v38, %v5008_v39 }
 0x2bb   : > { %v1732_v36 = vrot.slane %v5004_v33, 1  ;;  %v1789_v62 = vsel %vm4047_vm2, %v1731_v49, %v4962_v45  ;;  %v5036_v54 = vshrl.u32 %v4969_v22, 16  ;;  %v5042_v35 = vshrl.u32 %v4979_v61, 16 }
 0x2bc   : > { %v5039_v20 = vpack.c.bf16 %v1539_v19, %v1538_v26  ;;  %v1736_v9 = vrot.slane %v5018_v52, 1  ;;  %v1536_v40 = vmax.f32 %v4925_v12, 0.0  ;;  %v1537_v60 = vmax.f32 %v4927_v34, 0.0 }
 0x2bd   : > { %1868 = vrot.lane.b32.xlu0 %v1786_v14, %s3809_s20  ;;  %1826 = vrot.lane.b32.xlu1 %v1549_v29, %s3808_s18  ;;  %v1738_v29 = vrot.slane %v5012_v30, 1  ;;  %v1735_v43 = vor.u32 %v1734_v6, %v5036_v54  ;;  %v5051_v16 = vshrl.u32 %v4996_v13, 16  ;;  %v5054_v47 = vshll.u32 %v5020_v7, 16 }
 0x2be   : > { %v1542_v0 = vmax.f32 %v4935_v25, 0.0  ;;  %v1733_v57 = vor.u32 %v1732_v36, %v5042_v35  ;;  %v5059_v12 = vshrl.u32 %v4998_v10, 16  ;;  %v5061_v34 = vpack.c.bf16 %v1537_v60, %v1536_v40 }
 0x2bf   : > { %v5065_v5 = vor.u32 %v1738_v29, %v5051_v16  ;;  %v1540_v59 = vmax.f32 %v4933_v17, 0.0  ;;  %v1624_v21 = vrot.slane %v4913_v23, 7  ;;  %v1628_v58 = vrot.slane %v4950_v56, 7 }
 0x2c0   : > { %v1788_v25 = vsel %vm4047_vm2, %v1729_v2, %v4977_v44  ;;  %v5076_v42 = vor.u32 %v1736_v9, %v5059_v12  ;;  %v1742_v17 = vrot.slane %v5054_v47, 1  ;;  %v2019_v31 = vsel %vm734_vm3, %v4898_v11, 0 }
 0x2c1   : > { %1824 = vrot.lane.b32.xlu0 %v1548_v51, %s3808_s18  ;;  %1874 = vrot.lane.b32.xlu1 %v1789_v62, %s3809_s20  ;;  %v1543_v51 = vmax.f32 %v4937_v15, 0.0  ;;  %v5079_v15 = vshll.u32 %v5022_v48, 16  ;;  %v5087_v4 = vpack.c.bf16 %v1541_v37, %v1540_v59  ;;  %v1791_v38 = vsel %vm4047_vm2, %v1735_v43, %v4992_v27 }
 0x2c2   : > { %v5095_v46 = vor.u32 %v4939_v50, %v1624_v21  ;;  %v5098_v1 = vor.u32 %v4944_v28, %v1628_v58  ;;  %3292 = vmatpush3.bf16.msra.mxu1 %v2019_v31  ;;  %v1793_v11 = vsel %vm4047_vm2, %v5065_v5, %v5012_v30  ;;  %v5108_v49 = vshrl.u32 %v5020_v7, 16 }
 0x2c3   : > { %v5085_v3 = vpack.c.bf16 %v1543_v51, %v1542_v0  ;;  %v5111_v14 = vshrl.u32 %v5022_v48, 16  ;;  %3525 = vmatprep.subr.msk.bf16.mxu1 %vm734_vm3, %v5070_v53  ;;  %v1792_v50 = vsel %vm4047_vm2, %v5076_v42, %v5018_v52  ;;  %v1740_v28 = vrot.slane %v5079_v15, 1 }
 0x2c4   : > { %v1704_v6 = vsel %vm4175_vm6, %v4913_v23, %v5095_v46  ;;  %v1705_v26 = vsel %vm4175_vm6, %v4950_v56, %v5098_v1  ;;  %v1743_v19 = vor.u32 %v1742_v17, %v5108_v49  ;;  %v5133_v37 = vshrl.u32 %v5039_v20, 16  ;;  %v5332_v46 = vld [vmem:[#allocation7 + $0x10] sm:$0x3f]  }
 0x2c5   : > { %1872 = vrot.lane.b32.xlu0 %v1788_v25, %s3809_s20  ;;  %1830 = vrot.lane.b32.xlu1 %v4969_v22, %s3808_s18  ;;  %v1790_v22 = vsel %vm4047_vm2, %v1733_v57, %v5004_v33  ;;  %v5136_v2 = vshll.u32 %v5039_v20, 16  ;;  %v1636_v36 = vrot.slane %v4959_v55, 7  ;;  %v5140_v62 = vshrl.u32 %v5061_v34, 16 }
 0x2c6   : > { %v1632_v29 = vrot.slane %v4975_v18, 7  ;;  %v1644_v9 = vrot.slane %v4989_v63, 7  ;;  %v5146_v40 = vshll.u32 %v5061_v34, 16  ;;  %v5149_v60 = vshrl.u32 %v5085_v3, 16 }
 0x2c7   : > { %v5152_v43 = vor.u32 %v4946_v8, %v1636_v36  ;;  %v1652_v0 = vrot.slane %v5036_v54, 7  ;;  %v1648_v59 = vrot.slane %v5042_v35, 7  ;;  %v5169_v8 = vshrl.u32 %v5087_v4, 16 }
 0x2c8   : > { %v5156_v57 = vor.u32 %v4948_v41, %v1632_v29  ;;  %v5159_v51 = vor.u32 %v4962_v45, %v1644_v9  ;;  %v1685_v21 = vshll.u32 %v5085_v3, 16  ;;  %v1660_v45 = vrot.slane %v5051_v16, 7 }
 0x2c9   : > { %1828 = vrot.lane.b32.xlu0 %v4979_v61, %s3808_s18  ;;  %1878 = vrot.lane.b32.xlu1 %v1791_v38, %s3809_s20  ;;  %v1640_v61 = vrot.slane %v5008_v39, 7  ;;  %v1707_v41 = vsel %vm4175_vm6, %v4959_v55, %v5152_v43  ;;  %v5190_v25 = vor.u32 %v4992_v27, %v1652_v0  ;;  %v5193_v42 = vor.u32 %v5004_v33, %v1648_v59 }
 0x2ca   : > { %v5196_v17 = vor.u32 %v5012_v30, %v1660_v45  ;;  %v1656_v31 = vrot.slane %v5059_v12, 7  ;;  %v1668_v38 = vrot.slane %v5108_v49, 7  ;;  %v1664_v36 = vrot.slane %v5111_v14, 7 }
 0x2cb   : > { %v5162_v5 = vor.u32 %v4977_v44, %v1640_v61  ;;  %v1706_v44 = vsel %vm4175_vm6, %v4975_v18, %v5156_v57  ;;  %v1676_v27 = vrot.slane %v5133_v37, 7  ;;  %v1672_v29 = vrot.slane %v5140_v62, 7 }
 0x2cc   : > { %v1710_v33 = vsel %vm4175_vm6, %v5042_v35, %v5193_v42  ;;  %v1713_v30 = vsel %vm4175_vm6, %v5051_v16, %v5196_v17  ;;  %v5219_v9 = vor.u32 %v5018_v52, %v1656_v31  ;;  %v1684_v61 = vrot.slane %v5149_v60, 7 }
 0x2cd   : > { %1876 = vrot.lane.b32.xlu0 %v1790_v22, %s3809_s20  ;;  %1834 = vrot.lane.b32.xlu1 %v4996_v13, %s3808_s18  ;;  %v1709_v13 = vsel %vm4175_vm6, %v4989_v63, %v5159_v51  ;;  %v1708_v58 = vsel %vm4175_vm6, %v5008_v39, %v5162_v5  ;;  %v1711_v22 = vsel %vm4175_vm6, %v5036_v54, %v5190_v25  ;;  %v1681_v45 = vshll.u32 %v5087_v4, 16 }
 0x2ce   : > { %v5223_v0 = vor.u32 %v5054_v47, %v1668_v38  ;;  %v5232_v59 = vor.u32 %v5146_v40, %v1672_v29  ;;  %v1712_v52 = vsel %vm4175_vm6, %v5059_v12, %v5219_v9  ;;  %v5239_v31 = vor.u32 %v1685_v21, %v1684_v61 }
 0x2cf   : > { %v1680_v38 = vrot.slane %v5169_v8, 7  ;;  %v1795_v61 = vsel %vm4047_vm2, %v1743_v19, %v5054_v47  ;;  %v2188_v23 = vsel %vm734_vm3, %v5070_v53, 0  ;;  %v2360_v32 = vsel %vm734_vm3, %v5332_v46, 0 }
 0x2d1   : > { %1832 = vrot.lane.b32.xlu0 %v4998_v10, %s3808_s18  ;;  %1882 = vrot.lane.b32.xlu1 %v1793_v11, %s3809_s20  ;;  %v5226_v10 = vor.u32 %v5079_v15, %v1664_v36  ;;  %v5229_v11 = vor.u32 %v5136_v2, %v1676_v27  ;;  %v5265_v36 = vor.u32 %v1681_v45, %v1680_v38  ;;  %v1744_v27 = vrot.slane %v5146_v40, 1 }
 0x2d3   : > { %v6030_v9 = vsel %vm4175_vm6, %v5111_v14, %v5226_v10  ;;  %v6032_v10 = vsel %vm4175_vm6, %v5140_v62, %v5232_v59  ;;  %v6034_v59 = vsel %vm4175_vm6, %v5169_v8, %v5265_v36 }
 0x2d5   : > { %1880 = vrot.lane.b32.xlu0 %v1792_v50, %s3809_s20  ;;  %1838 = vrot.lane.b32.xlu1 %v5020_v7, %s3808_s18  ;;  %v1741_v7 = vor.u32 %v1740_v28, %v5111_v14  ;;  %v1746_v50 = vrot.slane %v5136_v2, 1  ;;  %v1750_v28 = vrot.slane %v1685_v21, 1 }
 0x2d7   : > { %v1794_v38 = vsel %vm4047_vm2, %v1741_v7, %v5079_v15  ;;  %v1747_v29 = vor.u32 %v1746_v50, %v5133_v37  ;;  %v1751_v19 = vor.u32 %v1750_v28, %v5149_v60 }
 0x2d9   : > { %1836 = vrot.lane.b32.xlu0 %v5022_v48, %s3808_s18  ;;  %1886 = vrot.lane.b32.xlu1 %v1795_v61, %s3809_s20  ;;  %v1797_v47 = vsel %vm4047_vm2, %v1747_v29, %v5136_v2  ;;  %v1745_v48 = vor.u32 %v1744_v27, %v5140_v62  ;;  %v1748_v61 = vrot.slane %v1681_v45, 1 }
 0x2db   : > { %v1796_v15 = vsel %vm4047_vm2, %v1745_v48, %v5146_v40  ;;  %v1749_v2 = vor.u32 %v1748_v61, %v5169_v8 }
 0x2dd   : > { %1884 = vrot.lane.b32.xlu0 %v1794_v38, %s3809_s20  ;;  %1842 = vrot.lane.b32.xlu1 %v5039_v20, %s3808_s18  ;;  %v1799_v20 = vsel %vm4047_vm2, %v1751_v19, %v1685_v21 }
 0x2e1   : > { %1840 = vrot.lane.b32.xlu0 %v5061_v34, %s3808_s18  ;;  %1890 = vrot.lane.b32.xlu1 %v1797_v47, %s3809_s20  ;;  %v1798_v34 = vsel %vm4047_vm2, %v1749_v2, %v1681_v45 }
 0x2e5   : > { %1888 = vrot.lane.b32.xlu0 %v1796_v15, %s3809_s20  ;;  %1846 = vrot.lane.b32.xlu1 %v5085_v3, %s3808_s18 }
 0x2e9   : > { %1844 = vrot.lane.b32.xlu0 %v5087_v4, %s3808_s18  ;;  %1894 = vrot.lane.b32.xlu1 %v1799_v20, %s3809_s20 }
 0x2ed   : > { %1892 = vrot.lane.b32.xlu0 %v1798_v34, %s3809_s20 }
 0x319   : > { %v1817_v40 = vpop.permute.xlu1 %1816 }
 0x31a   : > { %v1898_v3 = vsel %vm609_vm7, %v1704_v6, %v1817_v40 }
 0x320   : > { %v1819_v27 = vpop.permute.xlu0 %1818 }
 0x321   : > { %v1901_v24 = vsel %vm609_vm7, %v1705_v26, %v1819_v27 }
 0x323   : > { %v1865_v29 = vpop.permute.xlu1 %1864 }
 0x324   : > { %v5325_v4 = vsel %vm658_vm8, %v1898_v3, %v1865_v29  ;;  %v6031_v29 = vsel %vm4175_vm6, %v5133_v37, %v5229_v11 }
 0x327   : > { %v1867_v21 = vpop.permute.xlu0 %1866  ;;  %v1823_v45 = vpop.permute.xlu1 %1822 }
 0x328   : > { %v5328_v7 = vsel %vm658_vm8, %v1901_v24, %v1867_v21  ;;  %v1907_v53 = vsel %vm609_vm7, %v1707_v41, %v1823_v45 }
 0x329   : > { %3293 = vmatprep.mubr.msk.bf16.mxu1 %vm701_vm9, %v5328_v7 }
 0x32a   : > { %3294 = vmatmul.mubr.msk.bf16.vlgmr.msra.gmra.mrb[0].mxu1 %vm701_vm9, %v5325_v4 }
 0x32b   : > { %3326 = vmatpush3.bf16.msra.mxu1 %v2188_v23  ;;  %v1821_v56 = vpop.permute.xlu0 %1820  ;;  %v1871_v1 = vpop.permute.xlu1 %1870 }
 0x32c   : > { %3526 = vmatprep.subr.msk.bf16.mxu1 %vm734_vm3, %v5332_v46  ;;  %v1904_v6 = vsel %vm609_vm7, %v1706_v44, %v1821_v56  ;;  %v5353_v26 = vsel %vm658_vm8, %v1907_v53, %v1871_v1  ;;  %v6033_v56 = vsel %vm4175_vm6, %v5149_v60, %v5239_v31 }
 0x32f   : > { %v1869_v50 = vpop.permute.xlu0 %1868  ;;  %v1827_v38 = vpop.permute.xlu1 %1826 }
 0x330   : > { %v5356_v47 = vsel %vm658_vm8, %v1904_v6, %v1869_v50  ;;  %v1913_v18 = vsel %vm609_vm7, %v1709_v13, %v1827_v38 }
 0x331   : > { %3297 = vmatprep.mubr.msk.bf16.mxu1 %vm701_vm9, %v5356_v47 }
 0x332   : > { %3298 = vmatmul.mubr.msk.bf16.gmra.mrb[4].mxu1 %vm701_vm9, %v5353_v26 }
 0x333   : > { %v1825_v55 = vpop.permute.xlu0 %1824  ;;  %v1875_v43 = vpop.permute.xlu1 %1874 }
 0x334   : > { %v1910_v57 = vsel %vm609_vm7, %v1708_v58, %v1825_v55  ;;  %v5375_v41 = vsel %vm658_vm8, %v1913_v18, %v1875_v43 }
 0x337   : > { %v1873_v44 = vpop.permute.xlu0 %1872  ;;  %v1831_v48 = vpop.permute.xlu1 %1830 }
 0x338   : > { %v5378_v28 = vsel %vm658_vm8, %v1910_v57, %v1873_v44  ;;  %v1919_v39 = vsel %vm609_vm7, %v1711_v22, %v1831_v48 }
 0x339   : > { %3301 = vmatprep.mubr.msk.bf16.mxu1 %vm701_vm9, %v5378_v28 }
 0x33a   : > { %3302 = vmatmul.mubr.msk.bf16.gmra.mrb[8].mxu1 %vm701_vm9, %v5375_v41 }
 0x33b   : > { %v1829_v63 = vpop.permute.xlu0 %1828  ;;  %v1879_v51 = vpop.permute.xlu1 %1878 }
 0x33c   : > { %v1916_v5 = vsel %vm609_vm7, %v1710_v33, %v1829_v63  ;;  %v5397_v13 = vsel %vm658_vm8, %v1919_v39, %v1879_v51 }
 0x33f   : > { %v1877_v58 = vpop.permute.xlu0 %1876  ;;  %v1835_v15 = vpop.permute.xlu1 %1834 }
 0x340   : > { %v5400_v19 = vsel %vm658_vm8, %v1916_v5, %v1877_v58  ;;  %v1925_v35 = vsel %vm609_vm7, %v1713_v30, %v1835_v15  ;;  %v6029_v30 = vsel %vm4175_vm6, %v5108_v49, %v5223_v0 }
 0x341   : > { %3305 = vmatprep.mubr.msk.bf16.mxu1 %vm701_vm9, %v5400_v19 }
 0x342   : > { %3306 = vmatmul.mubr.msk.bf16.gmra.mrb[12].mxu1 %vm701_vm9, %v5397_v13 }
 0x343   : > { %v1833_v54 = vpop.permute.xlu0 %1832  ;;  %v1883_v25 = vpop.permute.xlu1 %1882 }
 0x344   : > { %v1922_v42 = vsel %vm609_vm7, %v1712_v52, %v1833_v54  ;;  %v1963_v22 = vsel %vm658_vm8, %v1925_v35, %v1883_v25 }
 0x347   : > { %v1881_v33 = vpop.permute.xlu0 %1880  ;;  %v1839_v61 = vpop.permute.xlu1 %1838 }
 0x348   : > { %v1961_v20 = vsel %vm658_vm8, %v1922_v42, %v1881_v33  ;;  %v1931_v12 = vsel %vm609_vm7, %v6029_v30, %v1839_v61 }
 0x349   : > { %3309 = vmatprep.mubr.msk.bf16.mxu1 %vm701_vm9, %v1961_v20 }
 0x34a   : > { %3310 = vmatmul.mubr.msk.bf16.gmra.mrb[16].mxu1 %vm701_vm9, %v1963_v22 }
 0x34b   : > { %v1837_v16 = vpop.permute.xlu0 %1836  ;;  %v1887_v17 = vpop.permute.xlu1 %1886 }
 0x34c   : > { %v1928_v52 = vsel %vm609_vm7, %v6030_v9, %v1837_v16  ;;  %v1967_v2 = vsel %vm658_vm8, %v1931_v12, %v1887_v17 }
 0x34f   : > { %v1885_v34 = vpop.permute.xlu0 %1884  ;;  %v1843_v40 = vpop.permute.xlu1 %1842 }
 0x350   : > { %v1965_v27 = vsel %vm658_vm8, %v1928_v52, %v1885_v34  ;;  %v1937_v14 = vsel %vm609_vm7, %v6031_v29, %v1843_v40 }
 0x351   : > { %3313 = vmatprep.mubr.msk.bf16.mxu1 %vm701_vm9, %v1965_v27 }
 0x352   : > { %3314 = vmatmul.mubr.msk.bf16.gmra.mrb[20].mxu1 %vm701_vm9, %v1967_v2 }
 0x353   : > { %v1841_v49 = vpop.permute.xlu0 %1840  ;;  %v1891_v0 = vpop.permute.xlu1 %1890 }
 0x354   : > { %v1934_v3 = vsel %vm609_vm7, %v6032_v10, %v1841_v49  ;;  %v1971_v24 = vsel %vm658_vm8, %v1937_v14, %v1891_v0 }
 0x357   : > { %v1889_v21 = vpop.permute.xlu0 %1888  ;;  %v1847_v45 = vpop.permute.xlu1 %1846 }
 0x358   : > { %v1969_v23 = vsel %vm658_vm8, %v1934_v3, %v1889_v21  ;;  %v1943_v62 = vsel %vm609_vm7, %v6033_v56, %v1847_v45 }
 0x359   : > { %3317 = vmatprep.mubr.msk.bf16.mxu1 %vm701_vm9, %v1969_v23 }
 0x35a   : > { %3318 = vmatmul.mubr.msk.bf16.gmra.mrb[24].mxu1 %vm701_vm9, %v1971_v24 }
 0x35b   : > { %v1845_v37 = vpop.permute.xlu0 %1844  ;;  %v1895_v11 = vpop.permute.xlu1 %1894 }
 0x35c   : > { %v1940_v1 = vsel %vm609_vm7, %v6034_v59, %v1845_v37  ;;  %v1975_v53 = vsel %vm658_vm8, %v1943_v62, %v1895_v11 }
 0x35f   : > { %v1893_v6 = vpop.permute.xlu0 %1892 }
 0x360   : > { %v1973_v50 = vsel %vm658_vm8, %v1940_v1, %v1893_v6 }
 0x361   : > { %3321 = vmatprep.mubr.msk.bf16.mxu1 %vm701_vm9, %v1973_v50 }
 0x362   : > { %3322 = vmatmul.mubr.msk.bf16.gmra.mrb[28].mxu1 %vm701_vm9, %v1975_v53 }
 0x363   : > { %3327 = vmatprep.mubr.msk.bf16.mxu1 %vm701_vm9, %v5325_v4 }
 0x36a   : > { %3328 = vmatmul.mubr.msk.bf16.vlgmr.msra.gmra.mrb[0].mxu1 %vm701_vm9, %v5328_v7 }
 0x36b   : > { %3360 = vmatpush3.bf16.msra.mxu1 %v2360_v32  ;;  %3331 = vmatprep.mubr.msk.bf16.mxu1 %vm701_vm9, %v5325_v4 }
 0x372   : > { %3332 = vmatmul.mubr.msk.bf16.gmra.mrb[4].mxu1 %vm701_vm9, %v5356_v47 }
 0x373   : > { %3335 = vmatprep.mubr.msk.bf16.mxu1 %vm701_vm9, %v5353_v26 }
 0x37a   : > { %3336 = vmatmul.mubr.msk.bf16.gmra.mrb[8].mxu1 %vm701_vm9, %v5378_v28 }
 0x37b   : > { %3339 = vmatprep.mubr.msk.bf16.mxu1 %vm701_vm9, %v5375_v41 }
 0x382   : > { %3340 = vmatmul.mubr.msk.bf16.gmra.mrb[12].mxu1 %vm701_vm9, %v5400_v19 }
 0x383   : > { %3343 = vmatprep.mubr.msk.bf16.mxu1 %vm701_vm9, %v5397_v13 }
 0x38a   : > { %3344 = vmatmul.mubr.msk.bf16.gmra.mrb[16].mxu1 %vm701_vm9, %v1961_v20 }
 0x38b   : > { %3347 = vmatprep.mubr.msk.bf16.mxu1 %vm701_vm9, %v1963_v22 }
 0x392   : > { %3348 = vmatmul.mubr.msk.bf16.gmra.mrb[20].mxu1 %vm701_vm9, %v1965_v27 }
 0x393   : > { %3351 = vmatprep.mubr.msk.bf16.mxu1 %vm701_vm9, %v1967_v2 }
 0x39a   : > { %3352 = vmatmul.mubr.msk.bf16.gmra.mrb[24].mxu1 %vm701_vm9, %v1969_v23 }
 0x39b   : > { %3355 = vmatprep.mubr.msk.bf16.mxu1 %vm701_vm9, %v1971_v24 }
 0x3a2   : > { %3356 = vmatmul.mubr.msk.bf16.gmra.mrb[28].mxu1 %vm701_vm9, %v1973_v50 }
 0x3a3   : > { %3361 = vmatprep.mubr.msk.bf16.mxu1 %vm701_vm9, %v5325_v4 }
 0x3aa   : > { %3362 = vmatmul.mubr.msk.bf16.vlgmr.msra.gmra.mrb[0].mxu1 %vm701_vm9, %v5356_v47 }
 0x3ab   : > { %3365 = vmatprep.mubr.msk.bf16.mxu1 %vm701_vm9, %v5353_v26 }
 0x3b2   : > { %3366 = vmatmul.mubr.msk.bf16.gmra.mrb[4].mxu1 %vm701_vm9, %v5378_v28 }
 0x3b3   : > { %3369 = vmatprep.mubr.msk.bf16.mxu1 %vm701_vm9, %v5375_v41 }
 0x3ba   : > { %3370 = vmatmul.mubr.msk.bf16.gmra.mrb[8].mxu1 %vm701_vm9, %v5400_v19 }
 0x3bb   : > { %3373 = vmatprep.mubr.msk.bf16.mxu1 %vm701_vm9, %v5397_v13 }
 0x3c2   : > { %3374 = vmatmul.mubr.msk.bf16.gmra.mrb[12].mxu1 %vm701_vm9, %v1961_v20 }
 0x3c3   : > { %3377 = vmatprep.mubr.msk.bf16.mxu1 %vm701_vm9, %v1963_v22 }
 0x3ca   : > { %3378 = vmatmul.mubr.msk.bf16.gmra.mrb[16].mxu1 %vm701_vm9, %v1965_v27 }
 0x3cb   : > { %3381 = vmatprep.mubr.msk.bf16.mxu1 %vm701_vm9, %v1967_v2 }
 0x3d2   : > { %3382 = vmatmul.mubr.msk.bf16.gmra.mrb[20].mxu1 %vm701_vm9, %v1969_v23 }
 0x3d3   : > { %3385 = vmatprep.mubr.msk.bf16.mxu1 %vm701_vm9, %v1971_v24 }
 0x3da   : > { %3386 = vmatmul.mubr.msk.bf16.gmra.mrb[24].mxu1 %vm701_vm9, %v1973_v50 }
 0x3db   : > { %3389 = vmatprep.mubr.msk.bf16.mxu1 %vm701_vm9, %v1975_v53 }
 0x3e2   : > { %3390 = vmatmul.mubr.msk.bf16.gmra.mrb[28].mxu1 %vm701_vm9, %v1973_v50 }
 0x47d   : > { %v5520_v60 = vpop.f32.mrb[0].mxu1 }
 0x47e   : > { %v5522_v8 = vpop.f32.mrb[1].mxu1  ;;  %v2626_v7 = vmul.f32 %v5520_v60, %v5520_v60  ;;  %v2558_v55 = vsel %vm609_vm7, %v5520_v60, 0.0 }
 0x47f   : > { %v2624_v31 = vmul.f32 %v5522_v8, %v5522_v8  ;;  %v5526_v36 = vpop.f32.mrb[2].mxu1  ;;  %v2555_v46 = vsel %vm609_vm7, %v5522_v8, 0.0 }
 0x480   : > { %v5528_v4 = vpop.f32.mrb[3].mxu1  ;;  %v2627_v18 = vmul.f32 %v5526_v36, %v5526_v36  ;;  %v2659_v48 = vsel %vm609_vm7, %v2626_v7, 0.0  ;;  %v2560_v28 = vsel %vm609_vm7, %v5526_v36, 0.0 }
 0x481   : > { %v2556_v26 = vsel %vm609_vm7, %v5528_v4, 0.0  ;;  %v2625_v38 = vmul.f32 %v5528_v4, %v5528_v4  ;;  %v2656_v43 = vsel %vm609_vm7, %v2624_v31, 0.0 }
 0x482   : > { %v2557_v47 = vadd.f32 %v2556_v26, %v2555_v46  ;;  %v2661_v13 = vsel %vm609_vm7, %v2627_v18, 0.0 }
 0x483   : > { %v2657_v57 = vsel %vm609_vm7, %v2625_v38, 0.0 }
 0x484   : > { %v2559_v41 = vadd.f32 %v2558_v55, %v2557_v47  ;;  %v2658_v44 = vadd.f32 %v2657_v57, %v2656_v43 }
 0x485   : > { %v5547_v63 = vpop.f32.mrb[4].mxu1 }
 0x486   : > { %v2660_v51 = vadd.f32 %v2659_v48, %v2658_v44  ;;  %v5549_v39 = vpop.f32.mrb[5].mxu1  ;;  %v2561_v5 = vadd.f32 %v2560_v28, %v2559_v41  ;;  %v2630_v42 = vmul.f32 %v5547_v63, %v5547_v63  ;;  %v2566_v17 = vsel %vm609_vm7, %v5547_v63, 0.0 }
 0x487   : > { %v2562_v58 = vsel %vm609_vm7, %v5549_v39, 0.0  ;;  %v2628_v15 = vmul.f32 %v5549_v39, %v5549_v39  ;;  %v5556_v19 = vpop.f32.mrb[6].mxu1 }
 0x488   : > { %v2563_v54 = vadd.f32 %v2562_v58, %v2561_v5  ;;  %v2662_v25 = vadd.f32 %v2661_v13, %v2660_v51  ;;  %v5558_v35 = vpop.f32.mrb[7].mxu1  ;;  %v2631_v30 = vmul.f32 %v5556_v19, %v5556_v19  ;;  %v2667_v2 = vsel %vm609_vm7, %v2630_v42, 0.0 }
 0x489   : > { %v2663_v22 = vsel %vm609_vm7, %v2628_v15, 0.0  ;;  %v2564_v33 = vsel %vm609_vm7, %v5558_v35, 0.0  ;;  %v2629_v61 = vmul.f32 %v5558_v35, %v5558_v35  ;;  %v2568_v34 = vsel %vm609_vm7, %v5556_v19, 0.0 }
 0x48a   : > { %v2664_v20 = vadd.f32 %v2663_v22, %v2662_v25  ;;  %v2565_v16 = vadd.f32 %v2564_v33, %v2563_v54  ;;  %v2669_v29 = vsel %vm609_vm7, %v2631_v30, 0.0 }
 0x48b   : > { %v2665_v12 = vsel %vm609_vm7, %v2629_v61, 0.0 }
 0x48c   : > { %v2567_v9 = vadd.f32 %v2566_v17, %v2565_v16  ;;  %v2666_v52 = vadd.f32 %v2665_v12, %v2664_v20 }
 0x48d   : > { %v5575_v40 = vpop.f32.mrb[8].mxu1 }
 0x48e   : > { %v2668_v27 = vadd.f32 %v2667_v2, %v2666_v52  ;;  %v5577_v49 = vpop.f32.mrb[9].mxu1  ;;  %v2569_v0 = vadd.f32 %v2568_v34, %v2567_v9  ;;  %v2634_v23 = vmul.f32 %v5575_v40, %v5575_v40  ;;  %v2574_v1 = vsel %vm609_vm7, %v5575_v40, 0.0 }
 0x48f   : > { %v2570_v14 = vsel %vm609_vm7, %v5577_v49, 0.0  ;;  %v2632_v10 = vmul.f32 %v5577_v49, %v5577_v49  ;;  %v5584_v3 = vpop.f32.mrb[10].mxu1 }
 0x490   : > { %v2571_v24 = vadd.f32 %v2570_v14, %v2569_v0  ;;  %v2670_v21 = vadd.f32 %v2669_v29, %v2668_v27  ;;  %v5586_v45 = vpop.f32.mrb[11].mxu1  ;;  %v2635_v53 = vmul.f32 %v5584_v3, %v5584_v3  ;;  %v2675_v31 = vsel %vm609_vm7, %v2634_v23, 0.0 }
 0x491   : > { %v2671_v37 = vsel %vm609_vm7, %v2632_v10, 0.0  ;;  %v2572_v11 = vsel %vm609_vm7, %v5586_v45, 0.0  ;;  %v2633_v56 = vmul.f32 %v5586_v45, %v5586_v45  ;;  %v2576_v7 = vsel %vm609_vm7, %v5584_v3, 0.0 }
 0x492   : > { %v2672_v62 = vadd.f32 %v2671_v37, %v2670_v21  ;;  %v2573_v59 = vadd.f32 %v2572_v11, %v2571_v24  ;;  %v2677_v55 = vsel %vm609_vm7, %v2635_v53, 0.0 }
 0x493   : > { %v2673_v6 = vsel %vm609_vm7, %v2633_v56, 0.0 }
 0x494   : > { %v2575_v50 = vadd.f32 %v2574_v1, %v2573_v59  ;;  %v2674_v32 = vadd.f32 %v2673_v6, %v2672_v62 }
 0x495   : > { %v5603_v46 = vpop.f32.mrb[12].mxu1 }
 0x496   : > { %v2676_v26 = vadd.f32 %v2675_v31, %v2674_v32  ;;  %v5605_v38 = vpop.f32.mrb[13].mxu1  ;;  %v2577_v47 = vadd.f32 %v2576_v7, %v2575_v50  ;;  %v2638_v28 = vmul.f32 %v5603_v46, %v5603_v46  ;;  %v2582_v54 = vsel %vm609_vm7, %v5603_v46, 0.0 }
 0x497   : > { %v2578_v43 = vsel %vm609_vm7, %v5605_v38, 0.0  ;;  %v2636_v18 = vmul.f32 %v5605_v38, %v5605_v38  ;;  %v5612_v57 = vpop.f32.mrb[14].mxu1 }
 0x498   : > { %v2579_v41 = vadd.f32 %v2578_v43, %v2577_v47  ;;  %v2678_v44 = vadd.f32 %v2677_v55, %v2676_v26  ;;  %v5614_v48 = vpop.f32.mrb[15].mxu1  ;;  %v2639_v25 = vmul.f32 %v5612_v57, %v5612_v57  ;;  %v2683_v61 = vsel %vm609_vm7, %v2638_v28, 0.0 }
 0x499   : > { %v2679_v51 = vsel %vm609_vm7, %v2636_v18, 0.0  ;;  %v2580_v5 = vsel %vm609_vm7, %v5614_v48, 0.0  ;;  %v2637_v13 = vmul.f32 %v5614_v48, %v5614_v48  ;;  %v2584_v20 = vsel %vm609_vm7, %v5612_v57, 0.0 }
 0x49a   : > { %v2680_v58 = vadd.f32 %v2679_v51, %v2678_v44  ;;  %v2581_v15 = vadd.f32 %v2580_v5, %v2579_v41  ;;  %v2685_v9 = vsel %vm609_vm7, %v2639_v25, 0.0 }
 0x49b   : > { %v2681_v42 = vsel %vm609_vm7, %v2637_v13, 0.0 }
 0x49c   : > { %v2583_v22 = vadd.f32 %v2582_v54, %v2581_v15  ;;  %v2682_v33 = vadd.f32 %v2681_v42, %v2680_v58 }
 0x49d   : > { %v5631_v16 = vpop.f32.mrb[16].mxu1 }
 0x49e   : > { %v2684_v17 = vadd.f32 %v2683_v61, %v2682_v33  ;;  %v5633_v30 = vpop.f32.mrb[17].mxu1  ;;  %v2585_v12 = vadd.f32 %v2584_v20, %v2583_v22  ;;  %v2642_v14 = vmul.f32 %v5631_v16, %v5631_v16  ;;  %v2590_v11 = vsel %vm609_vm7, %v5631_v16, 0.0 }
 0x49f   : > { %v2586_v52 = vsel %vm609_vm7, %v5633_v30, 0.0  ;;  %v2640_v2 = vmul.f32 %v5633_v30, %v5633_v30  ;;  %v5640_v34 = vpop.f32.mrb[18].mxu1 }
 0x4a0   : > { %v2587_v27 = vadd.f32 %v2586_v52, %v2585_v12  ;;  %v2686_v0 = vadd.f32 %v2685_v9, %v2684_v17  ;;  %v5642_v29 = vpop.f32.mrb[19].mxu1  ;;  %v2643_v56 = vmul.f32 %v5640_v34, %v5640_v34  ;;  %v2691_v53 = vsel %vm609_vm7, %v2642_v14, 0.0 }
 0x4a1   : > { %v2687_v10 = vsel %vm609_vm7, %v2640_v2, 0.0  ;;  %v2588_v24 = vsel %vm609_vm7, %v5642_v29, 0.0  ;;  %v2641_v21 = vmul.f32 %v5642_v29, %v5642_v29  ;;  %v2592_v6 = vsel %vm609_vm7, %v5640_v34, 0.0 }
 0x4a2   : > { %v2688_v23 = vadd.f32 %v2687_v10, %v2686_v0  ;;  %v2589_v37 = vadd.f32 %v2588_v24, %v2587_v27  ;;  %v2693_v26 = vsel %vm609_vm7, %v2643_v56, 0.0 }
 0x4a3   : > { %v2689_v62 = vsel %vm609_vm7, %v2641_v21, 0.0 }
 0x4a4   : > { %v2591_v59 = vadd.f32 %v2590_v11, %v2589_v37  ;;  %v2690_v1 = vadd.f32 %v2689_v62, %v2688_v23 }
 0x4a5   : > { %v5659_v50 = vpop.f32.mrb[20].mxu1 }
 0x4a6   : > { %v2692_v32 = vadd.f32 %v2691_v53, %v2690_v1  ;;  %v5661_v31 = vpop.f32.mrb[21].mxu1  ;;  %v2593_v7 = vadd.f32 %v2592_v6, %v2591_v59  ;;  %v2646_v28 = vmul.f32 %v5659_v50, %v5659_v50  ;;  %v2598_v54 = vsel %vm609_vm7, %v5659_v50, 0.0 }
 0x4a7   : > { %v2594_v47 = vsel %vm609_vm7, %v5661_v31, 0.0  ;;  %v2644_v55 = vmul.f32 %v5661_v31, %v5661_v31  ;;  %v5668_v43 = vpop.f32.mrb[22].mxu1 }
 0x4a8   : > { %v2595_v18 = vadd.f32 %v2594_v47, %v2593_v7  ;;  %v2694_v41 = vadd.f32 %v2693_v26, %v2692_v32  ;;  %v5670_v44 = vpop.f32.mrb[23].mxu1  ;;  %v2647_v25 = vmul.f32 %v5668_v43, %v5668_v43  ;;  %v2699_v61 = vsel %vm609_vm7, %v2646_v28, 0.0 }
 0x4a9   : > { %v2695_v51 = vsel %vm609_vm7, %v2644_v55, 0.0  ;;  %v2596_v5 = vsel %vm609_vm7, %v5670_v44, 0.0  ;;  %v2645_v13 = vmul.f32 %v5670_v44, %v5670_v44  ;;  %v2600_v20 = vsel %vm609_vm7, %v5668_v43, 0.0 }
 0x4aa   : > { %v2696_v58 = vadd.f32 %v2695_v51, %v2694_v41  ;;  %v2597_v15 = vadd.f32 %v2596_v5, %v2595_v18  ;;  %v2701_v2 = vsel %vm609_vm7, %v2647_v25, 0.0 }
 0x4ab   : > { %v2697_v42 = vsel %vm609_vm7, %v2645_v13, 0.0 }
 0x4ac   : > { %v2599_v22 = vadd.f32 %v2598_v54, %v2597_v15  ;;  %v2698_v33 = vadd.f32 %v2697_v42, %v2696_v58 }
 0x4ad   : > { %v5687_v17 = vpop.f32.mrb[24].mxu1 }
 0x4ae   : > { %v2700_v12 = vadd.f32 %v2699_v61, %v2698_v33  ;;  %v5689_v9 = vpop.f32.mrb[25].mxu1  ;;  %v2601_v52 = vadd.f32 %v2600_v20, %v2599_v22  ;;  %v2650_v23 = vmul.f32 %v5687_v17, %v5687_v17  ;;  %v2606_v1 = vsel %vm609_vm7, %v5687_v17, 0.0 }
 0x4af   : > { %v2602_v27 = vsel %vm609_vm7, %v5689_v9, 0.0  ;;  %v2648_v0 = vmul.f32 %v5689_v9, %v5689_v9  ;;  %v5696_v14 = vpop.f32.mrb[26].mxu1 }
 0x4b0   : > { %v2603_v10 = vadd.f32 %v2602_v27, %v2601_v52  ;;  %v2702_v24 = vadd.f32 %v2701_v2, %v2700_v12  ;;  %v5698_v21 = vpop.f32.mrb[27].mxu1  ;;  %v2651_v53 = vmul.f32 %v5696_v14, %v5696_v14  ;;  %v2707_v26 = vsel %vm609_vm7, %v2650_v23, 0.0 }
 0x4b1   : > { %v2703_v37 = vsel %vm609_vm7, %v2648_v0, 0.0  ;;  %v2604_v11 = vsel %vm609_vm7, %v5698_v21, 0.0  ;;  %v2649_v56 = vmul.f32 %v5698_v21, %v5698_v21  ;;  %v2608_v47 = vsel %vm609_vm7, %v5696_v14, 0.0 }
 0x4b2   : > { %v2704_v62 = vadd.f32 %v2703_v37, %v2702_v24  ;;  %v2605_v59 = vadd.f32 %v2604_v11, %v2603_v10  ;;  %v2709_v51 = vsel %vm609_vm7, %v2651_v53, 0.0 }
 0x4b3   : > { %v2705_v6 = vsel %vm609_vm7, %v2649_v56, 0.0 }
 0x4b4   : > { %v2607_v32 = vadd.f32 %v2606_v1, %v2605_v59  ;;  %v2706_v7 = vadd.f32 %v2705_v6, %v2704_v62 }
 0x4b5   : > { %v5715_v55 = vpop.f32.mrb[28].mxu1 }
 0x4b6   : > { %v2708_v18 = vadd.f32 %v2707_v26, %v2706_v7  ;;  %v5717_v41 = vpop.f32.mrb[29].mxu1  ;;  %v2609_v28 = vadd.f32 %v2608_v47, %v2607_v32  ;;  %v2654_v42 = vmul.f32 %v5715_v55, %v5715_v55  ;;  %v2614_v52 = vsel %vm609_vm7, %v5715_v55, 0.0 }
 0x4b7   : > { %v2610_v5 = vsel %vm609_vm7, %v5717_v41, 0.0  ;;  %v2652_v13 = vmul.f32 %v5717_v41, %v5717_v41  ;;  %v5724_v58 = vpop.f32.mrb[30].mxu1 }
 0x4b8   : > { %v2611_v15 = vadd.f32 %v2610_v5, %v2609_v28  ;;  %v2710_v54 = vadd.f32 %v2709_v51, %v2708_v18  ;;  %v5726_v25 = vpop.f32.mrb[31].mxu1  ;;  %v2655_v2 = vmul.f32 %v5724_v58, %v5724_v58  ;;  %v2715_v24 = vsel %vm609_vm7, %v2654_v42, 0.0 }
 0x4b9   : > { %v2711_v22 = vsel %vm609_vm7, %v2652_v13, 0.0  ;;  %v2612_v33 = vsel %vm609_vm7, %v5726_v25, 0.0  ;;  %v2653_v61 = vmul.f32 %v5726_v25, %v5726_v25  ;;  %v2616_v23 = vsel %vm609_vm7, %v5724_v58, 0.0 }
 0x4ba   : > { %v2712_v20 = vadd.f32 %v2711_v22, %v2710_v54  ;;  %v2613_v12 = vadd.f32 %v2612_v33, %v2611_v15  ;;  %v2717_v56 = vsel %vm609_vm7, %v2655_v2, 0.0 }
 0x4bb   : > { %v2713_v27 = vsel %vm609_vm7, %v2653_v61, 0.0 }
 0x4bc   : > { %v2615_v0 = vadd.f32 %v2614_v52, %v2613_v12  ;;  %v2714_v10 = vadd.f32 %v2713_v27, %v2712_v20 }
 0x4be   : > { %v2617_v37 = vadd.f32 %v2616_v23, %v2615_v0  ;;  %v2716_v11 = vadd.f32 %v2715_v24, %v2714_v10 }
 0x4c0   : > { %v2618_v62 = vrot.slane %v2617_v37, 4  ;;  %v2718_v59 = vadd.f32 %v2717_v56, %v2716_v11 }
 0x4c2   : > { %v2619_v1 = vadd.f32 %v2618_v62, %v2617_v37  ;;  %v2719_v53 = vrot.slane %v2718_v59, 4 }
 0x4c4   : > { %v2620_v6 = vrot.slane %v2619_v1, 2  ;;  %v2720_v32 = vadd.f32 %v2719_v53, %v2718_v59 }
 0x4c6   : > { %v2621_v7 = vadd.f32 %v2620_v6, %v2619_v1  ;;  %v2721_v26 = vrot.slane %v2720_v32, 2 }
 0x4c8   : > { %v2622_v47 = vrot.slane %v2621_v7, 1  ;;  %v2722_v18 = vadd.f32 %v2721_v26, %v2720_v32 }
 0x4ca   : > { %v2623_v28 = vadd.f32 %v2622_v47, %v2621_v7  ;;  %v2723_v51 = vrot.slane %v2722_v18, 1 }
 0x4cc   : > { %v2724_v5 = vadd.f32 %v2723_v51, %v2722_v18  ;;  %v5744_v13 = vmul.f32 0.00390625, %v2623_v28 }
 0x4ce   : > { %v2726_v15 = vmul.f32 0.00390625, %v2724_v5  ;;  %v2727_v54 = vmul.f32 %v5744_v13, %v5744_v13  ;;  %v2760_v42 = vsub.f32 %v5726_v25, %v5744_v13  ;;  %v2731_v22 = vsub.f32 %v5522_v8, %v5744_v13 }
 0x4cf   : > { %v2732_v33 = vsub.f32 %v5528_v4, %v5744_v13  ;;  %v2733_v61 = vsub.f32 %v5520_v60, %v5744_v13  ;;  %v2734_v20 = vsub.f32 %v5526_v36, %v5744_v13  ;;  %v2735_v12 = vsub.f32 %v5549_v39, %v5744_v13 }
 0x4d0   : > { %v2728_v52 = vsub.f32 %v2726_v15, %v2727_v54  ;;  %v2736_v2 = vsub.f32 %v5558_v35, %v5744_v13  ;;  %v2737_v25 = vsub.f32 %v5547_v63, %v5744_v13  ;;  %v2738_v8 = vsub.f32 %v5556_v19, %v5744_v13 }
 0x4d1   : > { %v2739_v4 = vsub.f32 %v5577_v49, %v5744_v13  ;;  %v2740_v60 = vsub.f32 %v5586_v45, %v5744_v13  ;;  %v2741_v36 = vsub.f32 %v5575_v40, %v5744_v13  ;;  %v2742_v39 = vsub.f32 %v5584_v3, %v5744_v13 }
 0x4d2   : > { %v2729_v27 = vadd.f32 1e-05, %v2728_v52  ;;  %v2743_v35 = vsub.f32 %v5605_v38, %v5744_v13  ;;  %v2744_v63 = vsub.f32 %v5614_v48, %v5744_v13  ;;  %v2745_v19 = vsub.f32 %v5603_v46, %v5744_v13 }
 0x4d3   : > { %v2746_v49 = vsub.f32 %v5612_v57, %v5744_v13  ;;  %v2747_v45 = vsub.f32 %v5633_v30, %v5744_v13  ;;  %v2748_v40 = vsub.f32 %v5642_v29, %v5744_v13  ;;  %v2749_v3 = vsub.f32 %v5631_v16, %v5744_v13 }
 0x4d4   : > { %3609 = vrsqrt.f32 %v2729_v27  ;;  %v2750_v38 = vsub.f32 %v5640_v34, %v5744_v13  ;;  %v2751_v48 = vsub.f32 %v5661_v31, %v5744_v13  ;;  %v2752_v46 = vsub.f32 %v5670_v44, %v5744_v13 }
 0x4d5   : > { %v2753_v57 = vsub.f32 %v5659_v50, %v5744_v13  ;;  %v2754_v30 = vsub.f32 %v5668_v43, %v5744_v13  ;;  %v2755_v29 = vsub.f32 %v5689_v9, %v5744_v13  ;;  %v2756_v16 = vsub.f32 %v5698_v21, %v5744_v13 }
 0x4d6   : > { %v2757_v34 = vsub.f32 %v5687_v17, %v5744_v13  ;;  %v2758_v31 = vsub.f32 %v5696_v14, %v5744_v13  ;;  %v2759_v44 = vsub.f32 %v5717_v41, %v5744_v13  ;;  %v2761_v50 = vsub.f32 %v5715_v55, %v5744_v13  ;;  %v3611_v14 = vld [vmem:[%s4010_s30 + $0xe8] sm:$0xff] }
 0x4d7   : > { %v2762_v43 = vsub.f32 %v5724_v58, %v5744_v13 }
 0x4de   : > { %v3610_v9 = vpop.eup %3609 }
 0x4df   : > { %v2792_v0 = vmul.f32 %v3610_v9, %v2760_v42  ;;  %v2763_v10 = vmul.f32 %v3610_v9, %v2731_v22  ;;  %v2764_v21 = vmul.f32 %v3610_v9, %v2732_v33  ;;  %v2765_v24 = vmul.f32 %v3610_v9, %v2733_v61 }
 0x4e0   : > { %v2766_v23 = vmul.f32 %v3610_v9, %v2734_v20  ;;  %v2767_v17 = vmul.f32 %v3610_v9, %v2735_v12  ;;  %v2768_v37 = vmul.f32 %v3610_v9, %v2736_v2  ;;  %v2769_v11 = vmul.f32 %v3610_v9, %v2737_v25  ;;  %v3612_v12 = vld [vmem:[%s4010_s30] sm:$0xff]  ;;  %v3613_v2 = vld [vmem:[%s4010_s30 + $0x8] sm:$0xff] }
 0x4e1   : > { %v2824_v56 = vadd.f32 %v3611_v14, %v2792_v0  ;;  %v2770_v62 = vmul.f32 %v3610_v9, %v2738_v8  ;;  %v2771_v41 = vmul.f32 %v3610_v9, %v2739_v4  ;;  %v2772_v59 = vmul.f32 %v3610_v9, %v2740_v60  ;;  %v3614_v8 = vld [vmem:[%s4010_s30 + $0x10] sm:$0xff]  ;;  %v3615_v60 = vld [vmem:[%s4010_s30 + $0x18] sm:$0xff] }
 0x4e2   : > { %v2773_v1 = vmul.f32 %v3610_v9, %v2741_v36  ;;  %v2774_v55 = vmul.f32 %v3610_v9, %v2742_v39  ;;  %v2775_v53 = vmul.f32 %v3610_v9, %v2743_v35  ;;  %v2776_v6 = vmul.f32 %v3610_v9, %v2744_v63  ;;  %v3616_v39 = vld [vmem:[%s4010_s30 + $0x20] sm:$0xff]  ;;  %v3617_v35 = vld [vmem:[%s4010_s30 + $0x28] sm:$0xff]  ;;  %v3627_v0 = vld [vmem:[%s4010_s30 + $0x78] sm:$0xff] }
 0x4e3   : > { %2856 = vst.msk [vmem:[%s5815_s17 + $0xe8] sm:$0xff] %vm609_vm7, %v2824_v56  ;;  %v2777_v58 = vmul.f32 %v3610_v9, %v2745_v19  ;;  %v2778_v32 = vmul.f32 %v3610_v9, %v2746_v49  ;;  %v2779_v7 = vmul.f32 %v3610_v9, %v2747_v45  ;;  %v2780_v26 = vmul.f32 %v3610_v9, %v2748_v40  ;;  %v3618_v19 = vld [vmem:[%s4010_s30 + $0x30] sm:$0xff]  ;;  %v3619_v45 = vld [vmem:[%s4010_s30 + $0x38] sm:$0xff] }
 0x4e4   : > { %v2781_v47 = vmul.f32 %v3610_v9, %v2749_v3  ;;  %v5819_v18 = vmul.f32 %v3610_v9, %v2750_v38  ;;  %v5821_v28 = vmul.f32 %v3610_v9, %v2751_v48  ;;  %v5823_v51 = vmul.f32 %v3610_v9, %v2752_v46  ;;  %v3620_v3 = vld [vmem:[%s4010_s30 + $0x40] sm:$0xff]  ;;  %v3621_v48 = vld [vmem:[%s4010_s30 + $0x48] sm:$0xff]  ;;  %v3631_v14 = vld [vmem:[%s4010_s30 + $0x98] sm:$0xff] }
 0x4e5   : > { %v5825_v5 = vmul.f32 %v3610_v9, %v2753_v57  ;;  %v5827_v13 = vmul.f32 %v3610_v9, %v2754_v30  ;;  %v5829_v15 = vmul.f32 %v3610_v9, %v2755_v29  ;;  %v5831_v54 = vmul.f32 %v3610_v9, %v2756_v16  ;;  %v3622_v57 = vld [vmem:[%s4010_s30 + $0x50] sm:$0xff]  ;;  %v3623_v29 = vld [vmem:[%s4010_s30 + $0x58] sm:$0xff] }
 0x4e6   : > { %v5833_v42 = vmul.f32 %v3610_v9, %v2757_v34  ;;  %v5835_v22 = vmul.f32 %v3610_v9, %v2758_v31  ;;  %v5837_v33 = vmul.f32 %v3610_v9, %v2759_v44  ;;  %v5839_v61 = vmul.f32 %v3610_v9, %v2761_v50  ;;  %v3624_v34 = vld [vmem:[%s4010_s30 + $0x60] sm:$0xff]  ;;  %v3625_v44 = vld [vmem:[%s4010_s30 + $0x68] sm:$0xff] }
 0x4e7   : > { %v5841_v20 = vmul.f32 %v3610_v9, %v2762_v43  ;;  %v2795_v52 = vadd.f32 %v3612_v12, %v2763_v10  ;;  %v2796_v25 = vadd.f32 %v3613_v2, %v2764_v21  ;;  %v2797_v4 = vadd.f32 %v3614_v8, %v2765_v24  ;;  %v3626_v43 = vld [vmem:[%s4010_s30 + $0x70] sm:$0xff]  ;;  %v3628_v21 = vld [vmem:[%s4010_s30 + $0x80] sm:$0xff]  ;;  %v3642_v12 = vld [vmem:[%s4010_s30 + $0xf8] sm:$0xff] }
 0x4e8   : > { %v2798_v36 = vadd.f32 %v3615_v60, %v2766_v23  ;;  %v2799_v27 = vadd.f32 %v3616_v39, %v2767_v17  ;;  %v2800_v63 = vadd.f32 %v3617_v35, %v2768_v37  ;;  %v2801_v49 = vadd.f32 %v3618_v19, %v2769_v11  ;;  %v3629_v23 = vld [vmem:[%s4010_s30 + $0x88] sm:$0xff]  ;;  %v3630_v37 = vld [vmem:[%s4010_s30 + $0x90] sm:$0xff] }
 0x4e9   : > { %v2802_v40 = vadd.f32 %v3619_v45, %v2770_v62  ;;  %v2803_v38 = vadd.f32 %v3620_v3, %v2771_v41  ;;  %v2804_v46 = vadd.f32 %v3621_v48, %v2772_v59  ;;  %v2805_v30 = vadd.f32 %v3622_v57, %v2773_v1  ;;  %2827 = vst.msk [vmem:[%s5815_s17] sm:$0xff] %vm609_vm7, %v2795_v52  ;;  %v3632_v62 = vld [vmem:[%s4010_s30 + $0xa0] sm:$0xff]  ;;  %v3633_v59 = vld [vmem:[%s4010_s30 + $0xa8] sm:$0xff] }
 0x4ea   : > { %2828 = vst.msk [vmem:[%s5815_s17 + $0x8] sm:$0xff] %vm609_vm7, %v2796_v25  ;;  %2829 = vst.msk [vmem:[%s5815_s17 + $0x10] sm:$0xff] %vm609_vm7, %v2797_v4  ;;  %v2806_v16 = vadd.f32 %v3623_v29, %v2774_v55  ;;  %v2807_v31 = vadd.f32 %v3624_v34, %v2775_v53  ;;  %v2808_v50 = vadd.f32 %v3625_v44, %v2776_v6  ;;  %v3634_v55 = vld [vmem:[%s4010_s30 + $0xb0] sm:$0xff]  ;;  %v3635_v6 = vld [vmem:[%s4010_s30 + $0xb8] sm:$0xff] }
 0x4eb   : > { %v2809_v9 = vadd.f32 %v3626_v43, %v2777_v58  ;;  %2830 = vst.msk [vmem:[%s5815_s17 + $0x18] sm:$0xff] %vm609_vm7, %v2798_v36  ;;  %2831 = vst.msk [vmem:[%s5815_s17 + $0x20] sm:$0xff] %vm609_vm7, %v2799_v27  ;;  %v2810_v10 = vadd.f32 %v3627_v0, %v2778_v32  ;;  %v2811_v24 = vadd.f32 %v3628_v21, %v2779_v7  ;;  %v3636_v32 = vld [vmem:[%s4010_s30 + $0xc0] sm:$0xff] }
 0x4ec   : > { %2832 = vst.msk [vmem:[%s5815_s17 + $0x28] sm:$0xff] %vm609_vm7, %v2800_v63  ;;  %2833 = vst.msk [vmem:[%s5815_s17 + $0x30] sm:$0xff] %vm609_vm7, %v2801_v49  ;;  %v2812_v17 = vadd.f32 %v3629_v23, %v2780_v26  ;;  %v2813_v11 = vadd.f32 %v3630_v37, %v2781_v47  ;;  %v2814_v56 = vadd.f32 %v3631_v14, %v5819_v18  ;;  %v3637_v26 = vld [vmem:[%s4010_s30 + $0xc8] sm:$0xff]  ;;  %v3638_v18 = vld [vmem:[%s4010_s30 + $0xd0] sm:$0xff] }
 0x4ed   : > { %2834 = vst.msk [vmem:[%s5815_s17 + $0x38] sm:$0xff] %vm609_vm7, %v2802_v40  ;;  %2835 = vst.msk [vmem:[%s5815_s17 + $0x40] sm:$0xff] %vm609_vm7, %v2803_v38  ;;  %v2815_v41 = vadd.f32 %v3632_v62, %v5821_v28  ;;  %v2816_v1 = vadd.f32 %v3633_v59, %v5823_v51  ;;  %v2817_v53 = vadd.f32 %v3634_v55, %v5825_v5  ;;  %v3639_v51 = vld [vmem:[%s4010_s30 + $0xd8] sm:$0xff] }
 0x4ee   : > { %2836 = vst.msk [vmem:[%s5815_s17 + $0x48] sm:$0xff] %vm609_vm7, %v2804_v46  ;;  %2837 = vst.msk [vmem:[%s5815_s17 + $0x50] sm:$0xff] %vm609_vm7, %v2805_v30  ;;  %v2818_v58 = vadd.f32 %v3635_v6, %v5827_v13  ;;  %v2819_v7 = vadd.f32 %v3636_v32, %v5829_v15  ;;  %v2820_v47 = vadd.f32 %v3637_v26, %v5831_v54  ;;  %v3640_v13 = vld [vmem:[%s4010_s30 + $0xe0] sm:$0xff]  ;;  %v3641_v54 = vld [vmem:[%s4010_s30 + $0xf0] sm:$0xff] }
 0x4ef   : > { %2838 = vst.msk [vmem:[%s5815_s17 + $0x58] sm:$0xff] %vm609_vm7, %v2806_v16  ;;  %2839 = vst.msk [vmem:[%s5815_s17 + $0x60] sm:$0xff] %vm609_vm7, %v2807_v31  ;;  %v2821_v28 = vadd.f32 %v3638_v18, %v5833_v42  ;;  %v2822_v5 = vadd.f32 %v3639_v51, %v5835_v22  ;;  %v2823_v15 = vadd.f32 %v3640_v13, %v5837_v33 }
 0x4f0   : > { %2840 = vst.msk [vmem:[%s5815_s17 + $0x68] sm:$0xff] %vm609_vm7, %v2808_v50  ;;  %2841 = vst.msk [vmem:[%s5815_s17 + $0x70] sm:$0xff] %vm609_vm7, %v2809_v9  ;;  %v2825_v42 = vadd.f32 %v3641_v54, %v5839_v61  ;;  %v2826_v52 = vadd.f32 %v3642_v12, %v5841_v20 }
 0x4f1   : > { %2842 = vst.msk [vmem:[%s5815_s17 + $0x78] sm:$0xff] %vm609_vm7, %v2810_v10  ;;  %2843 = vst.msk [vmem:[%s5815_s17 + $0x80] sm:$0xff] %vm609_vm7, %v2811_v24 }
 0x4f2   : > { %2844 = vst.msk [vmem:[%s5815_s17 + $0x88] sm:$0xff] %vm609_vm7, %v2812_v17  ;;  %2845 = vst.msk [vmem:[%s5815_s17 + $0x90] sm:$0xff] %vm609_vm7, %v2813_v11 }
 0x4f3   : > { %2846 = vst.msk [vmem:[%s5815_s17 + $0x98] sm:$0xff] %vm609_vm7, %v2814_v56  ;;  %2847 = vst.msk [vmem:[%s5815_s17 + $0xa0] sm:$0xff] %vm609_vm7, %v2815_v41 }
 0x4f4   : > { %2848 = vst.msk [vmem:[%s5815_s17 + $0xa8] sm:$0xff] %vm609_vm7, %v2816_v1  ;;  %2849 = vst.msk [vmem:[%s5815_s17 + $0xb0] sm:$0xff] %vm609_vm7, %v2817_v53 }
 0x4f5   : > { %2850 = vst.msk [vmem:[%s5815_s17 + $0xb8] sm:$0xff] %vm609_vm7, %v2818_v58  ;;  %2851 = vst.msk [vmem:[%s5815_s17 + $0xc0] sm:$0xff] %vm609_vm7, %v2819_v7 }
 0x4f6   : > { %2852 = vst.msk [vmem:[%s5815_s17 + $0xc8] sm:$0xff] %vm609_vm7, %v2820_v47  ;;  %2853 = vst.msk [vmem:[%s5815_s17 + $0xd0] sm:$0xff] %vm609_vm7, %v2821_v28 }
 0x4f7   : > { %2854 = vst.msk [vmem:[%s5815_s17 + $0xd8] sm:$0xff] %vm609_vm7, %v2822_v5  ;;  %2855 = vst.msk [vmem:[%s5815_s17 + $0xe0] sm:$0xff] %vm609_vm7, %v2823_v15 }
 0x4f8   : > { %2857 = vst.msk [vmem:[%s5815_s17 + $0xf0] sm:$0xff] %vm609_vm7, %v2825_v42  ;;  %2858 = vst.msk [vmem:[%s5815_s17 + $0xf8] sm:$0xff] %vm609_vm7, %v2826_v52 }
 0x4f9   : > { %3742 = shalt.err (!%p3739_p2)
}
 0x4fa   : > { %s3743_s8 = scalar_lea.hbm %s5923_s5, 4096  ;;  %s3747_s29 = scalar_lea.hbm %s6007_s3, 8192 }
 0x4fb   : > { %p3744_p13 = scmp.ne.s32.totalorder %s5923_s5, %s3743_s8  ;;  %p3748_p4 = scmp.lt.u32.totalorder %s5923_s5, %s6007_s3 }
 0x4fc   : > { %p3749_p5 = scmp.lt.u32.totalorder %s3747_s29, %s3743_s8  ;;  %p3751_p11 = scmp.lt.u32.totalorder %s3743_s8, %s5923_s5 }
 0x4fd   : > { %p3745_p6 = pnand %p3744_p13, %p6035_p0 }
 0x4fe   : > { %p3750_p8 = por %p3749_p5, %p3748_p4 }
 0x4ff   : > { %p3746_p10 = pneg %p3745_p6 }
 0x500   : > { %p3752_p1 = por %p3751_p11, %p3750_p8 }
 0x502   : > { %p3753_p3 = pnand %p3752_p1, %p3746_p10 }
 0x504   : > { %3756 = shalt.err (!%p3753_p3)
}
 0x505   : > { %s3811_s17 = smov 128  }
 0x506   : > { %3537 = dma.vmem_to_hbm [thread:$0]  (%p6035_p0), %s5943_s26, 4096, %s5923_s5, %s2860_s16, %s3811_s17, %s3811_s17, %s3809_s20  }
 0x507 PF: > { %s2888_s24 = sand.u32 1, %s3787_s12   ;;  %p6036_p7 = scmp.ne.s32.totalorder %s6012_s19, 0 }
 0x508   : > { %p6037_p9 = scmp.ge.s32.totalorder %s3799_s15, 2  ;;  %s2889_s27 = scalar_lea.sflag [#allocation4], %s2888_s24 }
 0x50a   : > { %p3551_p12 = pnand %p6037_p9, %p6036_p7 }
 0x50c   : > { %3782 = dma.done.wait (!%p3551_p12), %s2889_s27, 4096  }
 0x50d   : > { %3784 = vsyncadd (!%p3551_p12), %s2889_s27, 4294963200  ;;  %p17_p2 = scmp.ge.s32.totalorder %s3942_s4, 4   ;;  %s6038_s12 = smov %s3791_s13 }
 0x50e   : > { %s6039_s13 = smov %s3795_s14  ;;  %s6040_s14 = smov %s3958_s9 }
 0x50f   : > { %s6041_s15 = smov %s3942_s4  ;;  %19 = sbr.rel (!%p17_p2) target bundleno = 6 (0x6), region = 89 }
 0x516   :  { %2894 = vsyncpa [#allocation3], 1 }
 0x517   :  { %2896 = vsyncpa [#allocation3 + $0x1], 1 }
 0x518   :  { %2897 = vsyncpa [#allocation6], 1 }
 0x519   :  { %2898 = vsyncpa [#allocation4], 1 }
 0x51a   :  { %2900 = vsyncpa [#allocation4 + $0x1], 1 }

</bundles_post_ra>
